<compile_context>
chip_gen: v7x
topology: tpu7x:2x2x1
jax: 0.10.0
libtpu: 0.0.40
codegen_flags: <defaults>
</compile_context>

<pallas_src>
import functools

import numpy as np
import jax
import jax.numpy as jnp
from jax.experimental import pallas as pl
from jax.experimental.pallas import tpu as pltpu


# ----------------------------- fused Pallas kernel -------------------------- #

def _fused_kernel(x_ref, m1_ref, m2_ref, are_ref, aim_ref, m3_ref,
                  w1_ref, b1_ref, w2_ref, b2_ref, w3_ref, b3_ref,
                  y1_ref, y2_ref, out_ref):
    B = x_ref.shape[0] // 2                      # rows are [re_b0..re_bB, im_b0..im_bB]

    # complex "difference" conv 1 (center subtraction folded into m1)
    y1 = jnp.dot(x_ref[...], m1_ref[...], preferred_element_type=jnp.float32)
    y1_ref[...] = y1                             # pre-activation, returned as x1
    h1 = jnp.maximum(y1, 0.0)                    # tangentRELU == CReLU on re/im rows

    # complex "difference" conv 2
    y2 = jnp.dot(h1, m2_ref[...], preferred_element_type=jnp.float32)
    y2_ref[...] = y2                             # pre-activation, returned as x2
    h2 = jnp.maximum(y2, 0.0)

    # DistanceTransform: per-channel complex distance to anchors, then 3x3 conv
    re = h2[:B, :]
    im = h2[B:, :]
    dr = re - are_ref[...]
    di = im - aim_ref[...]
    d = jnp.sqrt(dr * dr + di * di)
    h3 = jnp.maximum(
        jnp.dot(d, m3_ref[...], preferred_element_type=jnp.float32), 0.0)

    # fused MLP head: 64 -> 16 -> 8 -> 2 with ReLU epilogues
    h = jnp.maximum(
        jnp.dot(h3, w1_ref[...], preferred_element_type=jnp.float32) + b1_ref[...], 0.0)
    h = jnp.maximum(
        jnp.dot(h, w2_ref[...], preferred_element_type=jnp.float32) + b2_ref[...], 0.0)
    h = jnp.maximum(
        jnp.dot(h, w3_ref[...], preferred_element_type=jnp.float32) + b3_ref[...], 0.0)
    out_ref[...] = h


def _fused_pallas(xin, prep):
    args = (xin, prep["m1"], prep["m2"], prep["a_re"], prep["a_im"], prep["m3"],
            prep["w_l1"], prep["b_l1"], prep["w_l2"], prep["b_l2"],
            prep["w_l3"], prep["b_l3"])

    def spec(a):
        return pl.BlockSpec(a.shape, lambda i: (0, 0))   # all args are 2-D, full blocks

    two_b = xin.shape[0]
    b = two_b // 2
    n1 = prep["m1"].shape[1]
    n2 = prep["m2"].shape[1]
    n_out = prep["w_l3"].shape[1]

    out_shape = (jax.ShapeDtypeStruct((two_b, n1), jnp.float32),
                 jax.ShapeDtypeStruct((two_b, n2), jnp.float32),
                 jax.ShapeDtypeStruct((b, n_out), jnp.float32))
    out_specs = (pl.BlockSpec((two_b, n1), lambda i: (0, 0)),
                 pl.BlockSpec((two_b, n2), lambda i: (0, 0)),
                 pl.BlockSpec((b, n_out), lambda i: (0, 0)))

    return pl.pallas_call(
        _fused_kernel,
        out_shape=out_shape,
        grid=(1,),
        in_specs=[spec(a) for a in args],
        out_specs=out_specs,
        compiler_params=pltpu.CompilerParams(dimension_semantics=("arbitrary",)),
    )(*args)


# -------------------------- parameter preparation --------------------------- #

def _fold_difference(w):
    """Fold the 'value - window-center value' subtraction into the conv weights.

    y = sum_k w_k*(p_k - p_center)  ==  conv with w' where
    w'[center] = w[center] - sum_k w_k (per output/input channel). Linear identity.
    """
    kh, kw = w.shape[2], w.shape[3]
    return w.at[:, :, kh // 2, kw // 2].add(-w.sum(axis=(2, 3)))


def _conv_unroll_matrix(w, h, wd, stride):
    """Unroll a valid (no-pad) strided conv into a dense matrix M so that
    x.reshape(N, Cin*H*W) @ M == conv(x, w) reshaped to (N, Cout*Ho*Wo)."""
    cout, cin, kh, kw = w.shape
    sh, sw = stride
    ho = (h - kh) // sh + 1
    wo = (wd - kw) // sw + 1
    co, ci, ki, kj, oi, oj = np.meshgrid(
        np.arange(cout), np.arange(cin), np.arange(kh), np.arange(kw),
        np.arange(ho), np.arange(wo), indexing="ij")
    rows = (ci * h * wd + (oi * sh + ki) * wd + (oj * sw + kj)).reshape(-1).astype(np.int32)
    cols = (co * (ho * wo) + oi * wo + oj).reshape(-1).astype(np.int32)
    vals = jnp.broadcast_to(w[:, :, :, :, None, None],
                            (cout, cin, kh, kw, ho, wo)).reshape(-1)
    m = jnp.zeros((cin * h * wd, cout * ho * wo), jnp.float32)
    return m.at[rows, cols].set(vals), ho, wo


def prepare_params(params, h, wd):
    """One-time weight prep: fold difference convs, unroll all convs to dense
    matmul matrices, pre-broadcast the distance anchors to one row."""
    w1 = _fold_difference(params["w_conv1"])
    m1, h1, w1o = _conv_unroll_matrix(w1, h, wd, (2, 2))
    w2 = _fold_difference(params["w_conv2"])
    m2, h2, w2o = _conv_unroll_matrix(w2, h1, w1o, (2, 2))
    m3, _, _ = _conv_unroll_matrix(params["w_dt"], h2, w2o, (1, 1))

    c = params["dt_anchor"].shape[0]
    sp = h2 * w2o
    a_re = jnp.repeat(params["dt_anchor"][:, 0], sp).reshape(1, c * sp)
    a_im = jnp.repeat(params["dt_anchor"][:, 1], sp).reshape(1, c * sp)

    return {
        "m1": m1, "m2": m2, "m3": m3, "a_re": a_re, "a_im": a_im,
        "w_l1": params["w_l1"], "b_l1": params["b_l1"].reshape(1, -1),
        "w_l2": params["w_l2"], "b_l2": params["b_l2"].reshape(1, -1),
        "w_l3": params["w_l3"], "b_l3": params["b_l3"].reshape(1, -1),
    }


# --------------------------------- forward ---------------------------------- #

def forward(x, prep):
    """Replicates Experimental_model0.forward; returns (out, x1, x2, x3)."""
    b, _, h, wd = x.shape
    h1 = (h - 3) // 2 + 1
    w1 = (wd - 3) // 2 + 1
    h2 = (h1 - 3) // 2 + 1
    w2 = (w1 - 3) // 2 + 1
    c1 = prep["m1"].shape[1] // (h1 * w1)
    c2 = prep["m2"].shape[1] // (h2 * w2)

    x3 = x[:, :, None, :, :]                                     # unsqueeze(2)
    xin = jnp.transpose(x, (1, 0, 2, 3)).reshape(2 * b, h * wd)  # component-major rows
    y1, y2, out = _fused_pallas(xin, prep)
    x1 = y1.reshape(2, b, c1, h1, w1).transpose(1, 0, 2, 3, 4)   # (B, 2, 8, 9, 9)
    x2 = y2.reshape(2, b, c2, h2, w2).transpose(1, 0, 2, 3, 4)   # (B, 2, 16, 4, 4)
    return out, x1, x2, x3


# ---------------------- pure-jnp reference (original math) ------------------ #

def _extract_patches(x, kh, kw, sh, sw):
    n, c, h, w = x.shape
    ho = (h - kh) // sh + 1
    wo = (w - kw) // sw + 1
    cols = []
    for i in range(kh):
        for j in range(kw):
            cols.append(x[:, :, i:i + sh * (ho - 1) + 1:sh, j:j + sw * (wo - 1) + 1:sw])
    p = jnp.stack(cols, axis=-1)                                 # (N, C, Ho, Wo, kh*kw)
    return jnp.transpose(p, (0, 2, 3, 1, 4)), ho, wo


def _ref_conv(x, w, stride, difference):
    n, cin, _, _ = x.shape
    cout, _, kh, kw = w.shape
    p, ho, wo = _extract_patches(x, kh, kw, stride[0], stride[1])
    if difference:
        center = (kh * kw) // 2
        p = p - p[..., center:center + 1]
    p = p.reshape(n * ho * wo, cin * kh * kw)
    y = jnp.dot(p, w.reshape(cout, -1).T, precision=jax.lax.Precision.HIGHEST)
    return y.reshape(n, ho, wo, cout).transpose(0, 3, 1, 2)


def _ref_difference_layer(z, w, stride):
    b, two, cin, h, wd = z.shape
    y = _ref_conv(z.reshape(b * two, cin, h, wd), w, stride, True)
    return y.reshape(b, two, y.shape[1], y.shape[2], y.shape[3])


def reference_forward(x, params):
    relu = lambda a: jnp.maximum(a, 0.0)
    x3 = x[:, :, None, :, :]
    x1 = _ref_difference_layer(x3, params["w_conv1"], (2, 2))
    xa = relu(x1)
    x2 = _ref_difference_layer(xa, params["w_conv2"], (2, 2))
    xb = relu(x2)
    re, im = xb[:, 0], xb[:, 1]
    a = params["dt_anchor"]
    d = jnp.sqrt((re - a[:, 0][None, :, None, None]) ** 2 +
                 (im - a[:, 1][None, :, None, None]) ** 2)
    xd = relu(_ref_conv(d, params["w_dt"], (1, 1), False))
    flat = xd.reshape(xd.shape[0], -1)
    h = relu(flat @ params["w_l1"] + params["b_l1"])
    h = relu(h @ params["w_l2"] + params["b_l2"])
    out = relu(h @ params["w_l3"] + params["b_l3"])
    return out, x1, x2, x3


# --------------------------------- params ----------------------------------- #

def init_params(key):
    ks = jax.random.split(key, 10)

    def w(k, shape, fan_in):
        return (jax.random.normal(k, shape, jnp.float32) / np.sqrt(fan_in)).astype(jnp.float32)

    return {
        "w_conv1": w(ks[0], (8, 1, 3, 3), 9),
        "w_conv2": w(ks[1], (16, 8, 3, 3), 72),
        "dt_anchor": w(ks[2], (16, 2), 1),
        "w_dt": w(ks[3], (16, 16, 3, 3), 144),
        "w_l1": w(ks[4], (64, 16), 64),
        "b_l1": w(ks[5], (16,), 64),
        "w_l2": w(ks[6], (16, 8), 16),
        "b_l2": w(ks[7], (8,), 16),
        "w_l3": w(ks[8], (8, 2), 8),
        "b_l3": w(ks[9], (2,), 8),
    }


if __name__ == "__main__":
    key = jax.random.PRNGKey(0)
    kx, kp = jax.random.split(key)
    B, H, W = 2, 20, 20                       # 20x20 input -> 64-dim flatten for the head
    x = jax.random.normal(kx, (B, 2, H, W), dtype=jnp.float32)   # (batch, re/im, H, W)
    params = init_params(kp)
    prep = prepare_params(params, H, W)       # one-time weight prep (outside hot path)

    fwd = jax.jit(forward)
    outs = jax.block_until_ready(fwd(x, prep))

    # correctness check against the original-formulation pure-jnp reference
    refs = reference_forward(x, params)
    for got, ref in zip(outs, refs):
        np.testing.assert_allclose(np.asarray(got), np.asarray(ref),
                                   rtol=2e-2, atol=2e-2)

    print("KERNEL_OK")
</pallas_src>

<mosaic_0001>
module attributes {stable_mosaic.version = 11 : i64} {
  func.func @_fused_kernel(%arg0: i32, %arg1: memref<4x400xf32, #tpu.memory_space<vmem>>, %arg2: memref<400x648xf32, #tpu.memory_space<vmem>>, %arg3: memref<648x256xf32, #tpu.memory_space<vmem>>, %arg4: memref<1x256xf32, #tpu.memory_space<vmem>>, %arg5: memref<1x256xf32, #tpu.memory_space<vmem>>, %arg6: memref<256x64xf32, #tpu.memory_space<vmem>>, %arg7: memref<64x16xf32, #tpu.memory_space<vmem>>, %arg8: memref<1x16xf32, #tpu.memory_space<vmem>>, %arg9: memref<16x8xf32, #tpu.memory_space<vmem>>, %arg10: memref<1x8xf32, #tpu.memory_space<vmem>>, %arg11: memref<8x2xf32, #tpu.memory_space<vmem>>, %arg12: memref<1x2xf32, #tpu.memory_space<vmem>>, %arg13: memref<4x648xf32, #tpu.memory_space<vmem>>, %arg14: memref<4x256xf32, #tpu.memory_space<vmem>>, %arg15: memref<2x2xf32, #tpu.memory_space<vmem>>) attributes {dimension_semantics = [#tpu.dimension_semantics<arbitrary>], iteration_bounds = array<i64: 1>, scalar_prefetch = 0 : i64, scratch_operands = 0 : i64, tpu.core_type = #tpu.core_type<tc>, window_params = [{pipeline_mode = #tpu.pipeline_mode<synchronous>, transform_indices = @transform_0, window_bounds = array<i64: 4, 400>}, {pipeline_mode = #tpu.pipeline_mode<synchronous>, transform_indices = @transform_1, window_bounds = array<i64: 400, 648>}, {pipeline_mode = #tpu.pipeline_mode<synchronous>, transform_indices = @transform_2, window_bounds = array<i64: 648, 256>}, {pipeline_mode = #tpu.pipeline_mode<synchronous>, transform_indices = @transform_3, window_bounds = array<i64: 1, 256>}, {pipeline_mode = #tpu.pipeline_mode<synchronous>, transform_indices = @transform_4, window_bounds = array<i64: 1, 256>}, {pipeline_mode = #tpu.pipeline_mode<synchronous>, transform_indices = @transform_5, window_bounds = array<i64: 256, 64>}, {pipeline_mode = #tpu.pipeline_mode<synchronous>, transform_indices = @transform_6, window_bounds = array<i64: 64, 16>}, {pipeline_mode = #tpu.pipeline_mode<synchronous>, transform_indices = @transform_7, window_bounds = array<i64: 1, 16>}, {pipeline_mode = #tpu.pipeline_mode<synchronous>, transform_indices = @transform_8, window_bounds = array<i64: 16, 8>}, {pipeline_mode = #tpu.pipeline_mode<synchronous>, transform_indices = @transform_9, window_bounds = array<i64: 1, 8>}, {pipeline_mode = #tpu.pipeline_mode<synchronous>, transform_indices = @transform_10, window_bounds = array<i64: 8, 2>}, {pipeline_mode = #tpu.pipeline_mode<synchronous>, transform_indices = @transform_11, window_bounds = array<i64: 1, 2>}, {pipeline_mode = #tpu.pipeline_mode<synchronous>, transform_indices = @transform_12, window_bounds = array<i64: 4, 648>}, {pipeline_mode = #tpu.pipeline_mode<synchronous>, transform_indices = @transform_13, window_bounds = array<i64: 4, 256>}, {pipeline_mode = #tpu.pipeline_mode<synchronous>, transform_indices = @transform_14, window_bounds = array<i64: 2, 2>}]} {
    %c0 = arith.constant 0 : index
    %c0_0 = arith.constant 0 : index
    %0 = vector.load %arg1[%c0, %c0_0] : memref<4x400xf32, #tpu.memory_space<vmem>>, vector<4x400xf32>
    %c0_1 = arith.constant 0 : index
    %c0_2 = arith.constant 0 : index
    %1 = vector.load %arg2[%c0_1, %c0_2] : memref<400x648xf32, #tpu.memory_space<vmem>>, vector<400x648xf32>
    %cst = arith.constant dense<0.000000e+00> : vector<4x648xf32>
    %2 = tpu.matmul %0, %1, %cst {dimension_numbers = #tpu.dot_dimension_numbers<[1], [0], [0], [1], [0, 0, 1, 1], [], []>} : vector<4x400xf32>, vector<400x648xf32>, vector<4x648xf32> -> vector<4x648xf32>
    %c0_3 = arith.constant 0 : index
    %c0_4 = arith.constant 0 : index
    %3 = vector.load %arg13[%c0_3, %c0_4] : memref<4x648xf32, #tpu.memory_space<vmem>>, vector<4x648xf32>
    tpu.vector_store %arg13[%c0_3, %c0_4], %2 {strides = array<i32>} : memref<4x648xf32, #tpu.memory_space<vmem>>, vector<4x648xf32>,
    %cst_5 = arith.constant 0.000000e+00 : f32
    %4 = vector.broadcast %cst_5 : f32 to vector<4x648xf32>
    %5 = arith.maximumf %2, %4 : vector<4x648xf32>
    %c0_6 = arith.constant 0 : index
    %c0_7 = arith.constant 0 : index
    %6 = vector.load %arg3[%c0_6, %c0_7] : memref<648x256xf32, #tpu.memory_space<vmem>>, vector<648x256xf32>
    %cst_8 = arith.constant dense<0.000000e+00> : vector<4x256xf32>
    %7 = tpu.matmul %5, %6, %cst_8 {dimension_numbers = #tpu.dot_dimension_numbers<[1], [0], [0], [1], [0, 0, 1, 1], [], []>} : vector<4x648xf32>, vector<648x256xf32>, vector<4x256xf32> -> vector<4x256xf32>
    %c0_9 = arith.constant 0 : index
    %c0_10 = arith.constant 0 : index
    %8 = vector.load %arg14[%c0_9, %c0_10] : memref<4x256xf32, #tpu.memory_space<vmem>>, vector<4x256xf32>
    tpu.vector_store %arg14[%c0_9, %c0_10], %7 {strides = array<i32>} : memref<4x256xf32, #tpu.memory_space<vmem>>, vector<4x256xf32>,
    %cst_11 = arith.constant 0.000000e+00 : f32
    %9 = vector.broadcast %cst_11 : f32 to vector<4x256xf32>
    %10 = arith.maximumf %7, %9 : vector<4x256xf32>
    %11 = vector.extract_strided_slice %10 {offsets = [0, 0], sizes = [2, 256], strides = [1, 1]} : vector<4x256xf32> to vector<2x256xf32>
    %12 = vector.extract_strided_slice %10 {offsets = [2, 0], sizes = [2, 256], strides = [1, 1]} : vector<4x256xf32> to vector<2x256xf32>
    %c0_12 = arith.constant 0 : index
    %c0_13 = arith.constant 0 : index
    %13 = vector.load %arg4[%c0_12, %c0_13] : memref<1x256xf32, #tpu.memory_space<vmem>>, vector<1x256xf32>
    %14 = vector.broadcast %13 : vector<1x256xf32> to vector<2x256xf32>
    %15 = arith.subf %11, %14 : vector<2x256xf32>
    %c0_14 = arith.constant 0 : index
    %c0_15 = arith.constant 0 : index
    %16 = vector.load %arg5[%c0_14, %c0_15] : memref<1x256xf32, #tpu.memory_space<vmem>>, vector<1x256xf32>
    %17 = vector.broadcast %16 : vector<1x256xf32> to vector<2x256xf32>
    %18 = arith.subf %12, %17 : vector<2x256xf32>
    %19 = arith.mulf %15, %15 : vector<2x256xf32>
    %20 = arith.mulf %18, %18 : vector<2x256xf32>
    %21 = arith.addf %19, %20 : vector<2x256xf32>
    %22 = math.sqrt %21 : vector<2x256xf32>
    %c0_16 = arith.constant 0 : index
    %c0_17 = arith.constant 0 : index
    %23 = vector.load %arg6[%c0_16, %c0_17] : memref<256x64xf32, #tpu.memory_space<vmem>>, vector<256x64xf32>
    %cst_18 = arith.constant dense<0.000000e+00> : vector<2x64xf32>
    %24 = tpu.matmul %22, %23, %cst_18 {dimension_numbers = #tpu.dot_dimension_numbers<[1], [0], [0], [1], [0, 0, 1, 1], [], []>} : vector<2x256xf32>, vector<256x64xf32>, vector<2x64xf32> -> vector<2x64xf32>
    %cst_19 = arith.constant 0.000000e+00 : f32
    %25 = vector.broadcast %cst_19 : f32 to vector<2x64xf32>
    %26 = arith.maximumf %24, %25 : vector<2x64xf32>
    %c0_20 = arith.constant 0 : index
    %c0_21 = arith.constant 0 : index
    %27 = vector.load %arg7[%c0_20, %c0_21] : memref<64x16xf32, #tpu.memory_space<vmem>>, vector<64x16xf32>
    %cst_22 = arith.constant dense<0.000000e+00> : vector<2x16xf32>
    %28 = tpu.matmul %26, %27, %cst_22 {dimension_numbers = #tpu.dot_dimension_numbers<[1], [0], [0], [1], [0, 0, 1, 1], [], []>} : vector<2x64xf32>, vector<64x16xf32>, vector<2x16xf32> -> vector<2x16xf32>
    %c0_23 = arith.constant 0 : index
    %c0_24 = arith.constant 0 : index
    %29 = vector.load %arg8[%c0_23, %c0_24] : memref<1x16xf32, #tpu.memory_space<vmem>>, vector<1x16xf32>
    %30 = vector.broadcast %29 : vector<1x16xf32> to vector<2x16xf32>
    %31 = arith.addf %28, %30 : vector<2x16xf32>
    %cst_25 = arith.constant 0.000000e+00 : f32
    %32 = vector.broadcast %cst_25 : f32 to vector<2x16xf32>
    %33 = arith.maximumf %31, %32 : vector<2x16xf32>
    %c0_26 = arith.constant 0 : index
    %c0_27 = arith.constant 0 : index
    %34 = vector.load %arg9[%c0_26, %c0_27] : memref<16x8xf32, #tpu.memory_space<vmem>>, vector<16x8xf32>
    %cst_28 = arith.constant dense<0.000000e+00> : vector<2x8xf32>
    %35 = tpu.matmul %33, %34, %cst_28 {dimension_numbers = #tpu.dot_dimension_numbers<[1], [0], [0], [1], [0, 0, 1, 1], [], []>} : vector<2x16xf32>, vector<16x8xf32>, vector<2x8xf32> -> vector<2x8xf32>
    %c0_29 = arith.constant 0 : index
    %c0_30 = arith.constant 0 : index
    %36 = vector.load %arg10[%c0_29, %c0_30] : memref<1x8xf32, #tpu.memory_space<vmem>>, vector<1x8xf32>
    %37 = vector.broadcast %36 : vector<1x8xf32> to vector<2x8xf32>
    %38 = arith.addf %35, %37 : vector<2x8xf32>
    %cst_31 = arith.constant 0.000000e+00 : f32
    %39 = vector.broadcast %cst_31 : f32 to vector<2x8xf32>
    %40 = arith.maximumf %38, %39 : vector<2x8xf32>
    %c0_32 = arith.constant 0 : index
    %c0_33 = arith.constant 0 : index
    %41 = vector.load %arg11[%c0_32, %c0_33] : memref<8x2xf32, #tpu.memory_space<vmem>>, vector<8x2xf32>
    %cst_34 = arith.constant dense<0.000000e+00> : vector<2x2xf32>
    %42 = tpu.matmul %40, %41, %cst_34 {dimension_numbers = #tpu.dot_dimension_numbers<[1], [0], [0], [1], [0, 0, 1, 1], [], []>} : vector<2x8xf32>, vector<8x2xf32>, vector<2x2xf32> -> vector<2x2xf32>
    %c0_35 = arith.constant 0 : index
    %c0_36 = arith.constant 0 : index
    %43 = vector.load %arg12[%c0_35, %c0_36] : memref<1x2xf32, #tpu.memory_space<vmem>>, vector<1x2xf32>
    %44 = vector.broadcast %43 : vector<1x2xf32> to vector<2x2xf32>
    %45 = arith.addf %42, %44 : vector<2x2xf32>
    %cst_37 = arith.constant 0.000000e+00 : f32
    %46 = vector.broadcast %cst_37 : f32 to vector<2x2xf32>
    %47 = arith.maximumf %45, %46 : vector<2x2xf32>
    %c0_38 = arith.constant 0 : index
    %c0_39 = arith.constant 0 : index
    %48 = vector.load %arg15[%c0_38, %c0_39] : memref<2x2xf32, #tpu.memory_space<vmem>>, vector<2x2xf32>
    tpu.vector_store %arg15[%c0_38, %c0_39], %47 {strides = array<i32>} : memref<2x2xf32, #tpu.memory_space<vmem>>, vector<2x2xf32>,
    return
  }
  func.func @transform_0(%arg0: i32) -> (i32, i32) {
    %c0_i32 = arith.constant 0 : i32
    %c0_i32_0 = arith.constant 0 : i32
    %c0_i32_1 = arith.constant 0 : i32
    return %c0_i32, %c0_i32_0 : i32, i32
  }
  func.func @transform_1(%arg0: i32) -> (i32, i32) {
    %c0_i32 = arith.constant 0 : i32
    %c0_i32_0 = arith.constant 0 : i32
    %c0_i32_1 = arith.constant 0 : i32
    return %c0_i32, %c0_i32_0 : i32, i32
  }
  func.func @transform_2(%arg0: i32) -> (i32, i32) {
    %c0_i32 = arith.constant 0 : i32
    %c0_i32_0 = arith.constant 0 : i32
    %c0_i32_1 = arith.constant 0 : i32
    return %c0_i32, %c0_i32_0 : i32, i32
  }
  func.func @transform_3(%arg0: i32) -> (i32, i32) {
    %c0_i32 = arith.constant 0 : i32
    %c0_i32_0 = arith.constant 0 : i32
    %c0_i32_1 = arith.constant 0 : i32
    return %c0_i32, %c0_i32_0 : i32, i32
  }
  func.func @transform_4(%arg0: i32) -> (i32, i32) {
    %c0_i32 = arith.constant 0 : i32
    %c0_i32_0 = arith.constant 0 : i32
    %c0_i32_1 = arith.constant 0 : i32
    return %c0_i32, %c0_i32_0 : i32, i32
  }
  func.func @transform_5(%arg0: i32) -> (i32, i32) {
    %c0_i32 = arith.constant 0 : i32
    %c0_i32_0 = arith.constant 0 : i32
    %c0_i32_1 = arith.constant 0 : i32
    return %c0_i32, %c0_i32_0 : i32, i32
  }
  func.func @transform_6(%arg0: i32) -> (i32, i32) {
    %c0_i32 = arith.constant 0 : i32
    %c0_i32_0 = arith.constant 0 : i32
    %c0_i32_1 = arith.constant 0 : i32
    return %c0_i32, %c0_i32_0 : i32, i32
  }
  func.func @transform_7(%arg0: i32) -> (i32, i32) {
    %c0_i32 = arith.constant 0 : i32
    %c0_i32_0 = arith.constant 0 : i32
    %c0_i32_1 = arith.constant 0 : i32
    return %c0_i32, %c0_i32_0 : i32, i32
  }
  func.func @transform_8(%arg0: i32) -> (i32, i32) {
    %c0_i32 = arith.constant 0 : i32
    %c0_i32_0 = arith.constant 0 : i32
    %c0_i32_1 = arith.constant 0 : i32
    return %c0_i32, %c0_i32_0 : i32, i32
  }
  func.func @transform_9(%arg0: i32) -> (i32, i32) {
    %c0_i32 = arith.constant 0 : i32
    %c0_i32_0 = arith.constant 0 : i32
    %c0_i32_1 = arith.constant 0 : i32
    return %c0_i32, %c0_i32_0 : i32, i32
  }
  func.func @transform_10(%arg0: i32) -> (i32, i32) {
    %c0_i32 = arith.constant 0 : i32
    %c0_i32_0 = arith.constant 0 : i32
    %c0_i32_1 = arith.constant 0 : i32
    return %c0_i32, %c0_i32_0 : i32, i32
  }
  func.func @transform_11(%arg0: i32) -> (i32, i32) {
    %c0_i32 = arith.constant 0 : i32
    %c0_i32_0 = arith.constant 0 : i32
    %c0_i32_1 = arith.constant 0 : i32
    return %c0_i32, %c0_i32_0 : i32, i32
  }
  func.func @transform_12(%arg0: i32) -> (i32, i32) {
    %c0_i32 = arith.constant 0 : i32
    %c0_i32_0 = arith.constant 0 : i32
    %c0_i32_1 = arith.constant 0 : i32
    return %c0_i32, %c0_i32_0 : i32, i32
  }
  func.func @transform_13(%arg0: i32) -> (i32, i32) {
    %c0_i32 = arith.constant 0 : i32
    %c0_i32_0 = arith.constant 0 : i32
    %c0_i32_1 = arith.constant 0 : i32
    return %c0_i32, %c0_i32_0 : i32, i32
  }
  func.func @transform_14(%arg0: i32) -> (i32, i32) {
    %c0_i32 = arith.constant 0 : i32
    %c0_i32_0 = arith.constant 0 : i32
    %c0_i32_1 = arith.constant 0 : i32
    return %c0_i32, %c0_i32_0 : i32, i32
  }
}

</mosaic_0001>

<bundles_post_ra>
// kernel: forward.1
= control target key start
LH: loop header
LB: loop body
LE: loop exit
PB: predicated region body
PF: predicated region fallthrough
CT: control target
= control target key end

     0   :  { %20 = vsyncpa [#allocation3], 0  ;;  %s2908_s0 = inlined_call_operand.vmem [shape: f32[4,400], index: 0, kind: input, shape index: {}]   ;;  %s2909_s1 = inlined_call_operand.hbm [shape: f32[400,648], index: 1, kind: input, shape index: {}]   ;;  %s2910_s2 = inlined_call_operand.hbm [shape: f32[648,256], index: 2, kind: input, shape index: {}]   ;;  %s2911_s3 = inlined_call_operand.hbm [shape: f32[1,256], index: 3, kind: input, shape index: {}]   ;;  %s2912_s4 = inlined_call_operand.hbm [shape: f32[1,256], index: 4, kind: input, shape index: {}]   ;;  %s2913_s5 = inlined_call_operand.vmem [shape: f32[256,64], index: 5, kind: input, shape index: {}]   ;;  %s2914_s6 = inlined_call_operand.vmem [shape: f32[64,16], index: 6, kind: input, shape index: {}]   ;;  %s2915_s7 = inlined_call_operand.hbm [shape: f32[1,16], index: 7, kind: input, shape index: {}]   ;;  %s2916_s8 = inlined_call_operand.vmem [shape: f32[16,8], index: 8, kind: input, shape index: {}]   ;;  %s2917_s9 = inlined_call_operand.hbm [shape: f32[1,8], index: 9, kind: input, shape index: {}]   ;;  %s2918_s10 = inlined_call_operand.vmem [shape: f32[8,2], index: 10, kind: input, shape index: {}]   ;;  %s2919_s11 = inlined_call_operand.hbm [shape: f32[1,2], index: 11, kind: input, shape index: {}]   ;;  %s2920_s12 = inlined_call_operand.vmem [shape: f32[4,648], index: 12, kind: output, shape index: {0}]   ;;  %s2921_s13 = inlined_call_operand.vmem [shape: f32[4,256], index: 13, kind: output, shape index: {1}]   ;;  %s2922_s14 = inlined_call_operand.hbm [shape: f32[2,2], index: 14, kind: output, shape index: {2}]  }
   0x1   :  { %21 = vsyncpa [#allocation6], 0 }
   0x2   :  { %22 = vsyncpa [#allocation9], 0 }
   0x3   :  { %23 = vsyncpa [#allocation12], 0 }
   0x4   :  { %24 = vsyncpa [#allocation4], 0  ;;  %s2531_s29 = smov [#allocation5]   ;;  %s2345_s17 = scalar_lea.hbm %s2910_s2, 20736 }
   0x5   :  { %s44_s30 = sshll.u32 %s2531_s29, 4  ;;  %p2346_p0 = scmp.ne.s32.totalorder %s2910_s2, %s2345_s17  ;;  %s45_s30 = int_to_ptr.vmem [resolvable:$true] %s44_s30 }
   0x6   :  { %p2349_p1 = scmp.lt.u32.totalorder %s2345_s17, %s2910_s2 }
   0x8   :  { %p2351_p2 = pnand %p2349_p1, %p2346_p0 }
   0xa   :  { %2354 = shalt.err (!%p2351_p2)
}
   0xb   :  { %s2355_s22 = scalar_lea.vmem %s45_s30, 20736  ;;  %p2360_p4 = scmp.lt.s32.totalorder %s45_s30, %s45_s30 }
   0xc   :  { %p2356_p3 = scmp.ne.s32.totalorder %s45_s30, %s2355_s22  ;;  %p2361_p5 = scmp.lt.s32.totalorder %s2355_s22, %s2355_s22 }
   0xe   :  { %p2362_p6 = por %p2361_p5, %p2360_p4 }
  0x10   :  { %p2363_p7 = pnand %p2362_p6, %p2356_p3 }
  0x12   :  { %2366 = shalt.err (!%p2363_p7)
}
  0x13   :  { %s2532_s23 = smov 256   ;;  %s2533_s24 = smov 16  }
  0x14   :  { %50 = dma.hbm_to_vmem [thread:$0]  %s2910_s2, 20736, %s45_s30, [#allocation6], %s2532_s23, %s2532_s23, %s2533_s24  }
  0x15   :  { %s2534_s27 = smov [#allocation8]   ;;  %s2535_s29 = smov [#allocation11]  }
  0x16   :  { %s67_s28 = sshll.u32 %s2534_s27, 4  ;;  %s93_s15 = sshll.u32 %s2535_s29, 4  ;;  %s68_s28 = int_to_ptr.vmem [resolvable:$true] %s67_s28  ;;  %s94_s15 = int_to_ptr.vmem [resolvable:$true] %s93_s15 }
  0x17   :  { %s2367_s18 = scalar_lea.hbm %s2912_s4, 32 }
  0x18   :  { %p2368_p8 = scmp.ne.s32.totalorder %s2912_s4, %s2367_s18  ;;  %p2371_p9 = scmp.lt.u32.totalorder %s2367_s18, %s2912_s4 }
  0x1a   :  { %p2373_p10 = pnand %p2371_p9, %p2368_p8 }
  0x1c   :  { %2376 = shalt.err (!%p2373_p10)
}
  0x1d   :  { %s2377_s2 = scalar_lea.vmem %s68_s28, 32  ;;  %p2382_p12 = scmp.lt.s32.totalorder %s68_s28, %s68_s28 }
  0x1e   :  { %p2378_p11 = scmp.ne.s32.totalorder %s68_s28, %s2377_s2  ;;  %p2383_p13 = scmp.lt.s32.totalorder %s2377_s2, %s2377_s2 }
  0x20   :  { %p2384_p0 = por %p2383_p13, %p2382_p12 }
  0x22   :  { %p2385_p1 = pnand %p2384_p0, %p2378_p11 }
  0x24   :  { %2388 = shalt.err (!%p2385_p1)
}
  0x25   :  { %70 = dma.hbm_to_vmem [thread:$0]  %s2912_s4, 32, %s68_s28, [#allocation9]  }
  0x26   :  { %s2389_s26 = scalar_lea.hbm %s2917_s9, 16 }
  0x27   :  { %p2390_p2 = scmp.ne.s32.totalorder %s2917_s9, %s2389_s26  ;;  %p2393_p3 = scmp.lt.u32.totalorder %s2389_s26, %s2917_s9 }
  0x29   :  { %p2395_p4 = pnand %p2393_p3, %p2390_p2 }
  0x2b   :  { %2398 = shalt.err (!%p2395_p4)
}
  0x2c   :  { %s2399_s18 = scalar_lea.vmem %s94_s15, 16  ;;  %s2403_s19 = scalar_lea.vmem %s94_s15, 32 }
  0x2d   :  { %p2400_p5 = scmp.ne.s32.totalorder %s94_s15, %s2399_s18  ;;  %p2404_p6 = scmp.lt.s32.totalorder %s94_s15, %s94_s15 }
  0x2e   :  { %p2405_p7 = scmp.lt.s32.totalorder %s2403_s19, %s2399_s18 }
  0x30   :  { %p2406_p8 = por %p2405_p7, %p2404_p6 }
  0x32   :  { %p2407_p9 = pnand %p2406_p8, %p2400_p5 }
  0x34   :  { %2410 = shalt.err (!%p2407_p9)
}
  0x35   :  { %96 = dma.hbm_to_vmem [thread:$0]  %s2917_s9, 16, %s94_s15, [#allocation12]  }
  0x36   :  { %s2536_s20 = smov [#allocation2]   ;;  %s2411_s30 = scalar_lea.hbm %s2909_s1, 38400 }
  0x37   :  { %s32_s21 = sshll.u32 %s2536_s20, 4  ;;  %p2412_p10 = scmp.ne.s32.totalorder %s2909_s1, %s2411_s30  ;;  %s33_s21 = int_to_ptr.vmem [resolvable:$true] %s32_s21 }
  0x38   :  { %p2415_p11 = scmp.lt.u32.totalorder %s2411_s30, %s2909_s1 }
  0x3a   :  { %p2417_p12 = pnand %p2415_p11, %p2412_p10 }
  0x3c   :  { %2420 = shalt.err (!%p2417_p12)
}
  0x3d   :  { %s2421_s27 = scalar_lea.vmem %s33_s21, 38400  ;;  %p2426_p0 = scmp.lt.s32.totalorder %s33_s21, %s33_s21 }
  0x3e   :  { %p2422_p13 = scmp.ne.s32.totalorder %s33_s21, %s2421_s27  ;;  %p2427_p1 = scmp.lt.s32.totalorder %s2421_s27, %s2421_s27 }
  0x40   :  { %p2428_p2 = por %p2427_p1, %p2426_p0 }
  0x42   :  { %p2429_p3 = pnand %p2428_p2, %p2422_p13 }
  0x44   :  { %2432 = shalt.err (!%p2429_p3)
}
  0x45   :  { %s2537_s9 = smov 768   ;;  %s2538_s15 = smov 48  }
  0x46   :  { %38 = dma.hbm_to_vmem [thread:$0]  %s2909_s1, 38400, %s33_s21, [#allocation3], %s2537_s9, %s2537_s9, %s2538_s15  }
  0x47   :  { %s2539_s17 = smov [#allocation7]   ;;  %s2540_s19 = smov [#allocation10]  }
  0x48   :  { %s57_s18 = sshll.u32 %s2539_s17, 4  ;;  %s81_s4 = sshll.u32 %s2540_s19, 4  ;;  %s58_s18 = int_to_ptr.vmem [resolvable:$true] %s57_s18  ;;  %s82_s4 = int_to_ptr.vmem [resolvable:$true] %s81_s4 }
  0x49   :  { %s2433_s22 = scalar_lea.hbm %s2911_s3, 32 }
  0x4a   :  { %p2434_p4 = scmp.ne.s32.totalorder %s2911_s3, %s2433_s22  ;;  %p2437_p5 = scmp.lt.u32.totalorder %s2433_s22, %s2911_s3 }
  0x4c   :  { %p2439_p6 = pnand %p2437_p5, %p2434_p4 }
  0x4e   :  { %2442 = shalt.err (!%p2439_p6)
}
  0x4f   :  { %s2443_s1 = scalar_lea.vmem %s58_s18, 32  ;;  %p2448_p8 = scmp.lt.s32.totalorder %s58_s18, %s58_s18 }
  0x50   :  { %p2444_p7 = scmp.ne.s32.totalorder %s58_s18, %s2443_s1  ;;  %p2449_p9 = scmp.lt.s32.totalorder %s2443_s1, %s2443_s1 }
  0x52   :  { %p2450_p10 = por %p2449_p9, %p2448_p8 }
  0x54   :  { %p2451_p11 = pnand %p2450_p10, %p2444_p7 }
  0x56   :  { %2454 = shalt.err (!%p2451_p11)
}
  0x57   :  { %60 = dma.hbm_to_vmem [thread:$0]  %s2911_s3, 32, %s58_s18, [#allocation6]  }
  0x58   :  { %s2455_s9 = scalar_lea.hbm %s2915_s7, 16 }
  0x59   :  { %p2456_p12 = scmp.ne.s32.totalorder %s2915_s7, %s2455_s9  ;;  %p2459_p13 = scmp.lt.u32.totalorder %s2455_s9, %s2915_s7 }
  0x5b   :  { %p2461_p0 = pnand %p2459_p13, %p2456_p12 }
  0x5d   :  { %2464 = shalt.err (!%p2461_p0)
}
  0x5e   :  { %s2465_s19 = scalar_lea.vmem %s82_s4, 16  ;;  %s2469_s28 = scalar_lea.vmem %s82_s4, 32 }
  0x5f   :  { %p2466_p1 = scmp.ne.s32.totalorder %s82_s4, %s2465_s19  ;;  %p2470_p2 = scmp.lt.s32.totalorder %s82_s4, %s82_s4 }
  0x60   :  { %p2471_p3 = scmp.lt.s32.totalorder %s2469_s28, %s2465_s19 }
  0x62   :  { %p2472_p4 = por %p2471_p3, %p2470_p2 }
  0x64   :  { %p2473_p5 = pnand %p2472_p4, %p2466_p1 }
  0x66   :  { %2476 = shalt.err (!%p2473_p5)
}
  0x67   :  { %84 = dma.hbm_to_vmem [thread:$0]  %s2915_s7, 16, %s82_s4, [#allocation9]  }
  0x68   :  { %s2541_s20 = smov [#allocation13]   ;;  %s2477_s23 = scalar_lea.hbm %s2919_s11, 16 }
  0x69   :  { %s105_s22 = sshll.u32 %s2541_s20, 4  ;;  %p2478_p6 = scmp.ne.s32.totalorder %s2919_s11, %s2477_s23  ;;  %s106_s22 = int_to_ptr.vmem [resolvable:$true] %s105_s22 }
  0x6a   :  { %p2481_p7 = scmp.lt.u32.totalorder %s2477_s23, %s2919_s11 }
  0x6c   :  { %p2483_p8 = pnand %p2481_p7, %p2478_p6 }
  0x6e   :  { %2486 = shalt.err (!%p2483_p8)
}
  0x6f   :  { %s2487_s26 = scalar_lea.vmem %s106_s22, 16  ;;  %s2491_s7 = scalar_lea.vmem %s106_s22, 32 }
  0x70   :  { %p2488_p9 = scmp.ne.s32.totalorder %s106_s22, %s2487_s26  ;;  %p2492_p10 = scmp.lt.s32.totalorder %s106_s22, %s106_s22 }
  0x71   :  { %p2493_p11 = scmp.lt.s32.totalorder %s2491_s7, %s2487_s26 }
  0x73   :  { %p2494_p12 = por %p2493_p11, %p2492_p10 }
  0x75   :  { %p2495_p13 = pnand %p2494_p12, %p2488_p9 }
  0x77   :  { %2498 = shalt.err (!%p2495_p13)
}
  0x78   :  { %108 = dma.hbm_to_vmem [thread:$0]  %s2919_s11, 16, %s106_s22, [#allocation12]  }
  0x79   :  { %2521 = dma.done.wait [#allocation3], 38400  }
  0x7a   :  { %2522 = vsyncadd [#allocation3], 4294928896 }
  0x7b   :  { %2523 = dma.done.wait [#allocation6], 20768  }
  0x7c   :  { %2524 = vsyncadd [#allocation6], 4294946528 }
  0x7d   :  { %2525 = dma.done.wait [#allocation9], 48  }
  0x7e   :  { %2526 = vsyncadd [#allocation9], 4294967248 }
  0x7f   :  { %2527 = dma.done.wait [#allocation12], 32  }
  0x80   :  { %2528 = vsyncadd [#allocation12], 4294967264  ;;  %v133_v0 = vld [vmem:[#allocation2 + $0x8] sm:$0xff]  ;;  %v139_v1 = vld [vmem:[#allocation2 + $0x38] sm:$0xff]  ;;  %vm437_vm0 = vcmask 130048   ;;  %vm880_vm1 = vcmask 1043456  }
  0x81   :  { %v132_v2 = vld [vmem:[#allocation2] sm:$0xff]  ;;  %v1806_v3 = vpack.c.bf16 %v139_v1, %v133_v0  ;;  %v138_v4 = vld [vmem:[#allocation2 + $0x30] sm:$0xff]  ;;  %v145_v5 = vld [vmem:[#allocation2 + $0x68] sm:$0xff]  ;;  %vm881_vm2 = vcmask 64516   ;;  %vm1052_vm4 = vcmask 64512   ;;  %vm2543_vm9 = vmmov 0  }
  0x82   :  { %v151_v6 = vld [vmem:[#allocation2 + $0x98] sm:$0xff]  ;;  %v1808_v7 = vpack.c.bf16 %v138_v4, %v132_v2  ;;  %v144_v9 = vld [vmem:[#allocation2 + $0x60] sm:$0xff]  ;;  %v150_v10 = vld [vmem:[#allocation2 + $0x90] sm:$0xff]  ;;  %vm1448_vm10 = vcmask 523264   ;;  %vm1688_vm11 = vcmask 9216  }
  0x83   :  { %v1810_v8 = vpack.c.bf16 %v151_v6, %v145_v5  ;;  %v157_v11 = vld [vmem:[#allocation2 + $0xc8] sm:$0xff]  ;;  %1807 = vmatprep.subr.bf16.mxu0 %v1806_v3  ;;  %v163_v12 = vld [vmem:[#allocation2 + $0xf8] sm:$0xff]  ;;  %v1812_v13 = vpack.c.bf16 %v150_v10, %v144_v9  ;;  %v156_v15 = vld [vmem:[#allocation2 + $0xc0] sm:$0xff] }
  0x84   :  { %1809 = vmatpush1.bf16.msra.mxu0 %v1808_v7  ;;  %v1814_v14 = vpack.c.bf16 %v163_v12, %v157_v11  ;;  %v162_v16 = vld [vmem:[#allocation2 + $0xf0] sm:$0xff]  ;;  %v169_v17 = vld [vmem:[#allocation2 + $0x128] sm:$0xff]  ;;  %v175_v18 = vld [vmem:[#allocation2 + $0x158] sm:$0xff] }
  0x85   :  { %1811 = vmatprep.subr.bf16.mxu0 %v1810_v8  ;;  %v1816_v19 = vpack.c.bf16 %v162_v16, %v156_v15  ;;  %v1818_v20 = vpack.c.bf16 %v175_v18, %v169_v17  ;;  %v168_v21 = vld [vmem:[#allocation2 + $0x120] sm:$0xff]  ;;  %v174_v22 = vld [vmem:[#allocation2 + $0x150] sm:$0xff]  ;;  %v181_v23 = vld [vmem:[#allocation2 + $0x188] sm:$0xff] }
  0x86   :  { %v187_v24 = vld [vmem:[#allocation2 + $0x1b8] sm:$0xff]  ;;  %v141_v26 = vld [vmem:[#allocation2 + $0x48] sm:$0xff]  ;;  %v1820_v27 = vpack.c.bf16 %v174_v22, %v168_v21  ;;  %v180_v28 = vld [vmem:[#allocation2 + $0x180] sm:$0xff] }
  0x87   :  { %v135_v25 = vld [vmem:[#allocation2 + $0x18] sm:$0xff]  ;;  %v134_v30 = vld [vmem:[#allocation2 + $0x10] sm:$0xff]  ;;  %v140_v31 = vld [vmem:[#allocation2 + $0x40] sm:$0xff]  ;;  %v1822_v32 = vpack.c.bf16 %v187_v24, %v181_v23 }
  0x88   :  { %1813 = vmatpush1.bf16.msra.mxu0 %v1812_v13  ;;  %v1906_v29 = vpack.c.bf16 %v141_v26, %v135_v25  ;;  %v186_v33 = vld [vmem:[#allocation2 + $0x1b0] sm:$0xff]  ;;  %v1908_v34 = vpack.c.bf16 %v140_v31, %v134_v30  ;;  %v147_v35 = vld [vmem:[#allocation2 + $0x78] sm:$0xff]  ;;  %v153_v36 = vld [vmem:[#allocation2 + $0xa8] sm:$0xff] }
  0x89   :  { %1815 = vmatprep.subr.bf16.mxu0 %v1814_v14  ;;  %v193_v37 = vld [vmem:[#allocation2 + $0x1e8] sm:$0xff]  ;;  %v199_v38 = vld [vmem:[#allocation2 + $0x218] sm:$0xff]  ;;  %v1910_v39 = vpack.c.bf16 %v153_v36, %v147_v35  ;;  %v146_v40 = vld [vmem:[#allocation2 + $0x70] sm:$0xff]  ;;  %v1824_v42 = vpack.c.bf16 %v186_v33, %v180_v28 }
  0x8a   :  { %1907 = vmatprep.subr.bf16.mxu1 %v1906_v29  ;;  %v152_v41 = vld [vmem:[#allocation2 + $0xa0] sm:$0xff]  ;;  %v159_v45 = vld [vmem:[#allocation2 + $0xd8] sm:$0xff]  ;;  %v165_v46 = vld [vmem:[#allocation2 + $0x108] sm:$0xff]  ;;  %v1826_v47 = vpack.c.bf16 %v199_v38, %v193_v37 }
  0x8b   :  { %1909 = vmatpush1.bf16.msra.mxu1 %v1908_v34  ;;  %v192_v43 = vld [vmem:[#allocation2 + $0x1e0] sm:$0xff]  ;;  %v1912_v44 = vpack.c.bf16 %v152_v41, %v146_v40  ;;  %v198_v48 = vld [vmem:[#allocation2 + $0x210] sm:$0xff]  ;;  %v1914_v49 = vpack.c.bf16 %v165_v46, %v159_v45  ;;  %v205_v52 = vld [vmem:[#allocation2 + $0x248] sm:$0xff] }
  0x8c   :  { %1817 = vmatpush1.bf16.msra.mxu0 %v1816_v19  ;;  %1911 = vmatprep.subr.bf16.mxu1 %v1910_v39  ;;  %v158_v50 = vld [vmem:[#allocation2 + $0xd0] sm:$0xff]  ;;  %v164_v51 = vld [vmem:[#allocation2 + $0x100] sm:$0xff]  ;;  %v211_v53 = vld [vmem:[#allocation2 + $0x278] sm:$0xff]  ;;  %v1828_v57 = vpack.c.bf16 %v198_v48, %v192_v43 }
  0x8d   :  { %1819 = vmatprep.subr.bf16.mxu0 %v1818_v20  ;;  %v171_v54 = vld [vmem:[#allocation2 + $0x138] sm:$0xff]  ;;  %v1916_v55 = vpack.c.bf16 %v164_v51, %v158_v50  ;;  %v177_v56 = vld [vmem:[#allocation2 + $0x168] sm:$0xff]  ;;  %v204_v58 = vld [vmem:[#allocation2 + $0x240] sm:$0xff]  ;;  %v1830_v62 = vpack.c.bf16 %v211_v53, %v205_v52 }
  0x8e   :  { %v1918_v59 = vpack.c.bf16 %v177_v56, %v171_v54  ;;  %v170_v60 = vld [vmem:[#allocation2 + $0x130] sm:$0xff]  ;;  %v176_v61 = vld [vmem:[#allocation2 + $0x160] sm:$0xff]  ;;  %v183_v0 = vld [vmem:[#allocation2 + $0x198] sm:$0xff] }
  0x8f   :  { %1913 = vmatpush1.bf16.msra.mxu1 %v1912_v44  ;;  %v210_v63 = vld [vmem:[#allocation2 + $0x270] sm:$0xff]  ;;  %v189_v1 = vld [vmem:[#allocation2 + $0x1c8] sm:$0xff]  ;;  %v223_v3 = vld [vmem:[#allocation2 + $0x2d8] sm:$0xff]  ;;  %v1920_v4 = vpack.c.bf16 %v176_v61, %v170_v60 }
  0x90   :  { %1821 = vmatpush1.bf16.msra.mxu0 %v1820_v27  ;;  %1915 = vmatprep.subr.bf16.mxu1 %v1914_v49  ;;  %v217_v2 = vld [vmem:[#allocation2 + $0x2a8] sm:$0xff]  ;;  %v1832_v5 = vpack.c.bf16 %v210_v63, %v204_v58  ;;  %v216_v6 = vld [vmem:[#allocation2 + $0x2a0] sm:$0xff]  ;;  %v1922_v7 = vpack.c.bf16 %v189_v1, %v183_v0  ;;  %v182_v8 = vld [vmem:[#allocation2 + $0x190] sm:$0xff] }
  0x91   :  { %1823 = vmatprep.subr.bf16.mxu0 %v1822_v32  ;;  %v188_v9 = vld [vmem:[#allocation2 + $0x1c0] sm:$0xff]  ;;  %v1834_v10 = vpack.c.bf16 %v223_v3, %v217_v2  ;;  %v222_v11 = vld [vmem:[#allocation2 + $0x2d0] sm:$0xff]  ;;  %v195_v12 = vld [vmem:[#allocation2 + $0x1f8] sm:$0xff] }
  0x92   :  { %v201_v13 = vld [vmem:[#allocation2 + $0x228] sm:$0xff]  ;;  %v235_v15 = vld [vmem:[#allocation2 + $0x338] sm:$0xff]  ;;  %v1924_v16 = vpack.c.bf16 %v188_v9, %v182_v8  ;;  %v1836_v17 = vpack.c.bf16 %v222_v11, %v216_v6  ;;  %v228_v18 = vld [vmem:[#allocation2 + $0x300] sm:$0xff] }
  0x93   :  { %1917 = vmatpush1.bf16.msra.mxu1 %v1916_v55  ;;  %v229_v14 = vld [vmem:[#allocation2 + $0x308] sm:$0xff]  ;;  %v1926_v19 = vpack.c.bf16 %v201_v13, %v195_v12  ;;  %v194_v20 = vld [vmem:[#allocation2 + $0x1f0] sm:$0xff]  ;;  %v200_v21 = vld [vmem:[#allocation2 + $0x220] sm:$0xff] }
  0x94   :  { %1825 = vmatpush1.bf16.msra.mxu0 %v1824_v42  ;;  %1919 = vmatprep.subr.bf16.mxu1 %v1918_v59  ;;  %v1838_v22 = vpack.c.bf16 %v235_v15, %v229_v14  ;;  %v234_v23 = vld [vmem:[#allocation2 + $0x330] sm:$0xff]  ;;  %v207_v24 = vld [vmem:[#allocation2 + $0x258] sm:$0xff]  ;;  %v213_v25 = vld [vmem:[#allocation2 + $0x288] sm:$0xff]  ;;  %v1928_v29 = vpack.c.bf16 %v200_v21, %v194_v20 }
  0x95   :  { %1827 = vmatprep.subr.bf16.mxu0 %v1826_v47  ;;  %v241_v26 = vld [vmem:[#allocation2 + $0x368] sm:$0xff]  ;;  %v247_v27 = vld [vmem:[#allocation2 + $0x398] sm:$0xff]  ;;  %v240_v28 = vld [vmem:[#allocation2 + $0x360] sm:$0xff]  ;;  %v1840_v30 = vpack.c.bf16 %v234_v23, %v228_v18  ;;  %v1930_v31 = vpack.c.bf16 %v213_v25, %v207_v24 }
  0x96   :  { %v206_v32 = vld [vmem:[#allocation2 + $0x250] sm:$0xff]  ;;  %v212_v33 = vld [vmem:[#allocation2 + $0x280] sm:$0xff]  ;;  %v1842_v35 = vpack.c.bf16 %v247_v27, %v241_v26  ;;  %v219_v37 = vld [vmem:[#allocation2 + $0x2b8] sm:$0xff] }
  0x97   :  { %1921 = vmatpush1.bf16.msra.mxu1 %v1920_v4  ;;  %v2708_v34 = vld [vmem:[%s2908_s0] sm:$0xff]  ;;  %v246_v36 = vld [vmem:[#allocation2 + $0x390] sm:$0xff]  ;;  %v225_v38 = vld [vmem:[#allocation2 + $0x2e8] sm:$0xff]  ;;  %v1932_v42 = vpack.c.bf16 %v212_v33, %v206_v32 }
  0x98   :  { %1829 = vmatpush1.bf16.msra.mxu0 %v1828_v57  ;;  %1923 = vmatprep.subr.bf16.mxu1 %v1922_v7  ;;  %v2712_v39 = vcombine.high %v2708_v34, %v2708_v34  ;;  %v253_v40 = vld [vmem:[#allocation2 + $0x3c8] sm:$0xff]  ;;  %v259_v41 = vld [vmem:[#allocation2 + $0x3f8] sm:$0xff]  ;;  %v1844_v43 = vpack.c.bf16 %v246_v36, %v240_v28  ;;  %v252_v44 = vld [vmem:[#allocation2 + $0x3c0] sm:$0xff]  ;;  %v1934_v45 = vpack.c.bf16 %v225_v38, %v219_v37 }
  0x99   :  { %1831 = vmatprep.subr.bf16.mxu0 %v1830_v62  ;;  %v218_v46 = vld [vmem:[#allocation2 + $0x2b0] sm:$0xff]  ;;  %v224_v47 = vld [vmem:[#allocation2 + $0x2e0] sm:$0xff]  ;;  %v1846_v48 = vpack.c.bf16 %v259_v41, %v253_v40  ;;  %v231_v50 = vld [vmem:[#allocation2 + $0x318] sm:$0xff] }
  0x9a   :  { %504 = vmatprep.mubr.f32.mxu0 %v2712_v39  ;;  %v258_v49 = vld [vmem:[#allocation2 + $0x3f0] sm:$0xff]  ;;  %v237_v51 = vld [vmem:[#allocation2 + $0x348] sm:$0xff]  ;;  %646 = vmatprep.mubr.f32.mxu1 %v2712_v39  ;;  %v271_v53 = vld [vmem:[#allocation2 + $0x458] sm:$0xff]  ;;  %v1936_v54 = vpack.c.bf16 %v224_v47, %v218_v46 }
  0x9b   :  { %1925 = vmatpush1.bf16.msra.mxu1 %v1924_v16  ;;  %v265_v52 = vld [vmem:[#allocation2 + $0x428] sm:$0xff]  ;;  %v1848_v55 = vpack.c.bf16 %v258_v49, %v252_v44  ;;  %v264_v56 = vld [vmem:[#allocation2 + $0x420] sm:$0xff]  ;;  %v1938_v57 = vpack.c.bf16 %v237_v51, %v231_v50  ;;  %v230_v58 = vld [vmem:[#allocation2 + $0x310] sm:$0xff] }
  0x9c   :  { %1833 = vmatpush1.bf16.msra.mxu0 %v1832_v5  ;;  %1927 = vmatprep.subr.bf16.mxu1 %v1926_v19  ;;  %v236_v59 = vld [vmem:[#allocation2 + $0x340] sm:$0xff]  ;;  %v1850_v60 = vpack.c.bf16 %v271_v53, %v265_v52  ;;  %v270_v61 = vld [vmem:[#allocation2 + $0x450] sm:$0xff]  ;;  %v243_v62 = vld [vmem:[#allocation2 + $0x378] sm:$0xff] }
  0x9d   :  { %1835 = vmatprep.subr.bf16.mxu0 %v1834_v10  ;;  %v249_v63 = vld [vmem:[#allocation2 + $0x3a8] sm:$0xff]  ;;  %v283_v1 = vld [vmem:[#allocation2 + $0x4b8] sm:$0xff]  ;;  %v1940_v2 = vpack.c.bf16 %v236_v59, %v230_v58  ;;  %v1852_v3 = vpack.c.bf16 %v270_v61, %v264_v56  ;;  %v276_v4 = vld [vmem:[#allocation2 + $0x480] sm:$0xff] }
  0x9e   :  { %v277_v0 = vld [vmem:[#allocation2 + $0x488] sm:$0xff]  ;;  %v1942_v5 = vpack.c.bf16 %v249_v63, %v243_v62  ;;  %v242_v6 = vld [vmem:[#allocation2 + $0x370] sm:$0xff]  ;;  %v248_v7 = vld [vmem:[#allocation2 + $0x3a0] sm:$0xff] }
  0x9f   :  { %1929 = vmatpush1.bf16.msra.mxu1 %v1928_v29  ;;  %v1854_v8 = vpack.c.bf16 %v283_v1, %v277_v0  ;;  %v282_v9 = vld [vmem:[#allocation2 + $0x4b0] sm:$0xff]  ;;  %v255_v10 = vld [vmem:[#allocation2 + $0x3d8] sm:$0xff]  ;;  %v261_v11 = vld [vmem:[#allocation2 + $0x408] sm:$0xff]  ;;  %v1944_v14 = vpack.c.bf16 %v248_v7, %v242_v6 }
  0xa0   :  { %1837 = vmatpush1.bf16.msra.mxu0 %v1836_v17  ;;  %1931 = vmatprep.subr.bf16.mxu1 %v1930_v31  ;;  %v289_v12 = vld [vmem:[#allocation2 + $0x4e8] sm:$0xff]  ;;  %v295_v13 = vld [vmem:[#allocation2 + $0x518] sm:$0xff]  ;;  %v1856_v15 = vpack.c.bf16 %v282_v9, %v276_v4  ;;  %v288_v16 = vld [vmem:[#allocation2 + $0x4e0] sm:$0xff]  ;;  %v1946_v17 = vpack.c.bf16 %v261_v11, %v255_v10 }
  0xa1   :  { %1839 = vmatprep.subr.bf16.mxu0 %v1838_v22  ;;  %v254_v18 = vld [vmem:[#allocation2 + $0x3d0] sm:$0xff]  ;;  %v260_v19 = vld [vmem:[#allocation2 + $0x400] sm:$0xff]  ;;  %v1858_v20 = vpack.c.bf16 %v295_v13, %v289_v12  ;;  %v267_v22 = vld [vmem:[#allocation2 + $0x438] sm:$0xff] }
  0xa2   :  { %v294_v21 = vld [vmem:[#allocation2 + $0x510] sm:$0xff]  ;;  %v273_v23 = vld [vmem:[#allocation2 + $0x468] sm:$0xff]  ;;  %v307_v25 = vld [vmem:[#allocation2 + $0x578] sm:$0xff]  ;;  %v1948_v26 = vpack.c.bf16 %v260_v19, %v254_v18 }
  0xa3   :  { %1933 = vmatpush1.bf16.msra.mxu1 %v1932_v42  ;;  %v301_v24 = vld [vmem:[#allocation2 + $0x548] sm:$0xff]  ;;  %v1860_v27 = vpack.c.bf16 %v294_v21, %v288_v16  ;;  %v300_v28 = vld [vmem:[#allocation2 + $0x540] sm:$0xff]  ;;  %v1950_v29 = vpack.c.bf16 %v273_v23, %v267_v22  ;;  %v306_v33 = vld [vmem:[#allocation2 + $0x570] sm:$0xff] }
  0xa4   :  { %1841 = vmatpush1.bf16.msra.mxu0 %v1840_v30  ;;  %1935 = vmatprep.subr.bf16.mxu1 %v1934_v45  ;;  %v266_v30 = vld [vmem:[#allocation2 + $0x430] sm:$0xff]  ;;  %v272_v31 = vld [vmem:[#allocation2 + $0x460] sm:$0xff]  ;;  %v1862_v32 = vpack.c.bf16 %v307_v25, %v301_v24  ;;  %v285_v36 = vld [vmem:[#allocation2 + $0x4c8] sm:$0xff]  ;;  %v1864_v41 = vpack.c.bf16 %v306_v33, %v300_v28 }
  0xa5   :  { %1843 = vmatprep.subr.bf16.mxu0 %v1842_v35  ;;  %v279_v35 = vld [vmem:[#allocation2 + $0x498] sm:$0xff]  ;;  %v313_v37 = vld [vmem:[#allocation2 + $0x5a8] sm:$0xff]  ;;  %v1952_v40 = vpack.c.bf16 %v272_v31, %v266_v30  ;;  %v312_v42 = vld [vmem:[#allocation2 + $0x5a0] sm:$0xff] }
  0xa6   :  { %v319_v38 = vld [vmem:[#allocation2 + $0x5d8] sm:$0xff]  ;;  %v278_v44 = vld [vmem:[#allocation2 + $0x490] sm:$0xff]  ;;  %v284_v45 = vld [vmem:[#allocation2 + $0x4c0] sm:$0xff] }
  0xa7   :  { %1937 = vmatpush1.bf16.msra.mxu1 %v1936_v54  ;;  %v1866_v46 = vpack.c.bf16 %v319_v38, %v313_v37  ;;  %v318_v47 = vld [vmem:[#allocation2 + $0x5d0] sm:$0xff]  ;;  %v297_v49 = vld [vmem:[#allocation2 + $0x528] sm:$0xff]  ;;  %v331_v51 = vld [vmem:[#allocation2 + $0x638] sm:$0xff]  ;;  %v1956_v52 = vpack.c.bf16 %v284_v45, %v278_v44 }
  0xa8   :  { %1845 = vmatpush1.bf16.msra.mxu0 %v1844_v43  ;;  %1939 = vmatprep.subr.bf16.mxu1 %v1938_v57  ;;  %v1954_v43 = vpack.c.bf16 %v285_v36, %v279_v35  ;;  %v325_v50 = vld [vmem:[#allocation2 + $0x608] sm:$0xff]  ;;  %v1868_v53 = vpack.c.bf16 %v318_v47, %v312_v42  ;;  %v324_v54 = vld [vmem:[#allocation2 + $0x600] sm:$0xff]  ;;  %v290_v56 = vld [vmem:[#allocation2 + $0x4f0] sm:$0xff] }
  0xa9   :  { %1847 = vmatprep.subr.bf16.mxu0 %v1846_v48  ;;  %v291_v48 = vld [vmem:[#allocation2 + $0x4f8] sm:$0xff]  ;;  %v296_v57 = vld [vmem:[#allocation2 + $0x520] sm:$0xff]  ;;  %v1870_v58 = vpack.c.bf16 %v331_v51, %v325_v50  ;;  %v330_v59 = vld [vmem:[#allocation2 + $0x630] sm:$0xff] }
  0xaa   :  { %v309_v61 = vld [vmem:[#allocation2 + $0x588] sm:$0xff]  ;;  %v343_v63 = vld [vmem:[#allocation2 + $0x698] sm:$0xff]  ;;  %v1960_v1 = vpack.c.bf16 %v296_v57, %v290_v56  ;;  %v308_v6 = vld [vmem:[#allocation2 + $0x580] sm:$0xff] }
  0xab   :  { %1941 = vmatpush1.bf16.msra.mxu1 %v1940_v2  ;;  %v337_v62 = vld [vmem:[#allocation2 + $0x668] sm:$0xff]  ;;  %v1872_v2 = vpack.c.bf16 %v330_v59, %v324_v54  ;;  %v315_v9 = vld [vmem:[#allocation2 + $0x5b8] sm:$0xff]  ;;  %v348_v16 = vld [vmem:[#allocation2 + $0x6c0] sm:$0xff] }
  0xac   :  { %1849 = vmatpush1.bf16.msra.mxu0 %v1848_v55  ;;  %1943 = vmatprep.subr.bf16.mxu1 %v1942_v5  ;;  %v1958_v55 = vpack.c.bf16 %v297_v49, %v291_v48  ;;  %v2719_v0 = vld [vmem:[%s2908_s0 + $0x8] sm:$0xff]  ;;  %v302_v5 = vld [vmem:[#allocation2 + $0x550] sm:$0xff]  ;;  %v1874_v7 = vpack.c.bf16 %v343_v63, %v337_v62  ;;  %v355_v13 = vld [vmem:[#allocation2 + $0x6f8] sm:$0xff] }
  0xad   :  { %1851 = vmatprep.subr.bf16.mxu0 %v1850_v60  ;;  %v303_v60 = vld [vmem:[#allocation2 + $0x558] sm:$0xff]  ;;  %v321_v10 = vld [vmem:[#allocation2 + $0x5e8] sm:$0xff]  ;;  %v2723_v11 = vcombine.high %v2719_v0, %v2719_v0  ;;  %v314_v18 = vld [vmem:[#allocation2 + $0x5b0] sm:$0xff] }
  0xae   :  { %v1962_v4 = vpack.c.bf16 %v309_v61, %v303_v60  ;;  %v349_v12 = vld [vmem:[#allocation2 + $0x6c8] sm:$0xff]  ;;  %v320_v19 = vld [vmem:[#allocation2 + $0x5e0] sm:$0xff]  ;;  %v354_v21 = vld [vmem:[#allocation2 + $0x6f0] sm:$0xff] }
  0xaf   :  { %1945 = vmatpush1.bf16.msra.mxu1 %v1944_v14  ;;  %v1964_v14 = vpack.c.bf16 %v308_v6, %v302_v5  ;;  %v327_v22 = vld [vmem:[#allocation2 + $0x618] sm:$0xff]  ;;  %v333_v23 = vld [vmem:[#allocation2 + $0x648] sm:$0xff]  ;;  %v360_v28 = vld [vmem:[#allocation2 + $0x720] sm:$0xff] }
  0xb0   :  { %1853 = vmatpush1.bf16.msra.mxu0 %v1852_v3  ;;  %1947 = vmatprep.subr.bf16.mxu1 %v1946_v17  ;;  %v336_v3 = vld [vmem:[#allocation2 + $0x660] sm:$0xff]  ;;  %v1966_v17 = vpack.c.bf16 %v321_v10, %v315_v9  ;;  %v361_v24 = vld [vmem:[#allocation2 + $0x728] sm:$0xff]  ;;  %v367_v25 = vld [vmem:[#allocation2 + $0x758] sm:$0xff] }
  0xb1   :  { %1855 = vmatprep.subr.bf16.mxu0 %v1854_v8  ;;  %v342_v8 = vld [vmem:[#allocation2 + $0x690] sm:$0xff]  ;;  %v332_v31 = vld [vmem:[#allocation2 + $0x640] sm:$0xff]  ;;  %v339_v35 = vld [vmem:[#allocation2 + $0x678] sm:$0xff] }
  0xb2   :  { %v326_v30 = vld [vmem:[#allocation2 + $0x610] sm:$0xff]  ;;  %v345_v36 = vld [vmem:[#allocation2 + $0x6a8] sm:$0xff]  ;;  %v379_v38 = vld [vmem:[#allocation2 + $0x7b8] sm:$0xff] }
  0xb3   :  { %1949 = vmatpush1.bf16.msra.mxu1 %v1948_v26  ;;  %v1968_v26 = vpack.c.bf16 %v320_v19, %v314_v18  ;;  %v366_v33 = vld [vmem:[#allocation2 + $0x750] sm:$0xff]  ;;  %v373_v37 = vld [vmem:[#allocation2 + $0x788] sm:$0xff]  ;;  %v372_v42 = vld [vmem:[#allocation2 + $0x780] sm:$0xff] }
  0xb4   :  { %1857 = vmatpush1.bf16.msra.mxu0 %v1856_v15  ;;  %1951 = vmatprep.subr.bf16.mxu1 %v1950_v29  ;;  %v1876_v15 = vpack.c.bf16 %v342_v8, %v336_v3  ;;  %v1970_v29 = vpack.c.bf16 %v333_v23, %v327_v22  ;;  %v338_v44 = vld [vmem:[#allocation2 + $0x670] sm:$0xff]  ;;  %v344_v45 = vld [vmem:[#allocation2 + $0x6a0] sm:$0xff]  ;;  %v351_v48 = vld [vmem:[#allocation2 + $0x6d8] sm:$0xff] }
  0xb5   :  { %1859 = vmatprep.subr.bf16.mxu0 %v1858_v20  ;;  %v1878_v20 = vpack.c.bf16 %v355_v13, %v349_v12  ;;  %v378_v47 = vld [vmem:[#allocation2 + $0x7b0] sm:$0xff]  ;;  %v357_v49 = vld [vmem:[#allocation2 + $0x708] sm:$0xff]  ;;  %v391_v51 = vld [vmem:[#allocation2 + $0x818] sm:$0xff] }
  0xb6   :  { %v385_v50 = vld [vmem:[#allocation2 + $0x7e8] sm:$0xff]  ;;  %v384_v54 = vld [vmem:[#allocation2 + $0x7e0] sm:$0xff]  ;;  %v350_v56 = vld [vmem:[#allocation2 + $0x6d0] sm:$0xff] }
  0xb7   :  { %1953 = vmatpush1.bf16.msra.mxu1 %v1952_v40  ;;  %v1972_v40 = vpack.c.bf16 %v332_v31, %v326_v30  ;;  %v356_v57 = vld [vmem:[#allocation2 + $0x700] sm:$0xff]  ;;  %v390_v59 = vld [vmem:[#allocation2 + $0x810] sm:$0xff]  ;;  %v363_v60 = vld [vmem:[#allocation2 + $0x738] sm:$0xff] }
  0xb8   :  { %1861 = vmatpush1.bf16.msra.mxu0 %v1860_v27  ;;  %1955 = vmatprep.subr.bf16.mxu1 %v1954_v43  ;;  %v1880_v27 = vpack.c.bf16 %v354_v21, %v348_v16  ;;  %v1974_v43 = vpack.c.bf16 %v345_v36, %v339_v35  ;;  %v369_v61 = vld [vmem:[#allocation2 + $0x768] sm:$0xff]  ;;  %v403_v63 = vld [vmem:[#allocation2 + $0x878] sm:$0xff]  ;;  %v368_v5 = vld [vmem:[#allocation2 + $0x760] sm:$0xff] }
  0xb9   :  { %1863 = vmatprep.subr.bf16.mxu0 %v1862_v32  ;;  %v1882_v32 = vpack.c.bf16 %v367_v25, %v361_v24  ;;  %v397_v62 = vld [vmem:[#allocation2 + $0x848] sm:$0xff]  ;;  %v1982_v3 = vpack.c.bf16 %v369_v61, %v363_v60  ;;  %v375_v8 = vld [vmem:[#allocation2 + $0x798] sm:$0xff]  ;;  %v380_v18 = vld [vmem:[#allocation2 + $0x7c0] sm:$0xff] }
  0xba   :  { %v1894_v6 = vpack.c.bf16 %v403_v63, %v397_v62  ;;  %v381_v9 = vld [vmem:[#allocation2 + $0x7c8] sm:$0xff]  ;;  %v415_v12 = vld [vmem:[#allocation2 + $0x8d8] sm:$0xff]  ;;  %v392_v30 = vld [vmem:[#allocation2 + $0x820] sm:$0xff] }
  0xbb   :  { %1957 = vmatpush1.bf16.msra.mxu1 %v1956_v52  ;;  %v1976_v52 = vpack.c.bf16 %v344_v45, %v338_v44  ;;  %v409_v10 = vld [vmem:[#allocation2 + $0x8a8] sm:$0xff]  ;;  %v1986_v16 = vpack.c.bf16 %v381_v9, %v375_v8  ;;  %v387_v21 = vld [vmem:[#allocation2 + $0x7f8] sm:$0xff]  ;;  %v404_v44 = vld [vmem:[#allocation2 + $0x880] sm:$0xff] }
  0xbc   :  { %1865 = vmatpush1.bf16.msra.mxu0 %v1864_v41  ;;  %1959 = vmatprep.subr.bf16.mxu1 %v1958_v55  ;;  %v1884_v41 = vpack.c.bf16 %v366_v33, %v360_v28  ;;  %v1978_v55 = vpack.c.bf16 %v357_v49, %v351_v48  ;;  %v1898_v19 = vpack.c.bf16 %v415_v12, %v409_v10  ;;  %v393_v22 = vld [vmem:[#allocation2 + $0x828] sm:$0xff]  ;;  %v427_v24 = vld [vmem:[#allocation2 + $0x938] sm:$0xff]  ;;  %vm882_vm3 = vmor %vm881_vm2, %vm880_vm1 }
  0xbd   :  { %1867 = vmatprep.subr.bf16.mxu0 %v1866_v46  ;;  %v1886_v46 = vpack.c.bf16 %v379_v38, %v373_v37  ;;  %v421_v23 = vld [vmem:[#allocation2 + $0x908] sm:$0xff]  ;;  %v1990_v28 = vpack.c.bf16 %v393_v22, %v387_v21  ;;  %v399_v33 = vld [vmem:[#allocation2 + $0x858] sm:$0xff] }
  0xbe   :  { %v1902_v31 = vpack.c.bf16 %v427_v24, %v421_v23  ;;  %v405_v35 = vld [vmem:[#allocation2 + $0x888] sm:$0xff]  ;;  %v143_v37 = vld [vmem:[#allocation2 + $0x58] sm:$0xff] }
  0xbf   :  { %1961 = vmatpush1.bf16.msra.mxu1 %v1960_v1  ;;  %v1892_v1 = vpack.c.bf16 %v390_v59, %v384_v54  ;;  %v137_v36 = vld [vmem:[#allocation2 + $0x28] sm:$0xff]  ;;  %v423_v59 = vld [vmem:[#allocation2 + $0x918] sm:$0xff] }
  0xc0   :  { %1869 = vmatpush1.bf16.msra.mxu0 %v1868_v53  ;;  %1963 = vmatprep.subr.bf16.mxu1 %v1962_v4  ;;  %v1888_v53 = vpack.c.bf16 %v378_v47, %v372_v42  ;;  %v362_v4 = vld [vmem:[#allocation2 + $0x730] sm:$0xff]  ;;  %v1994_v42 = vpack.c.bf16 %v405_v35, %v399_v33  ;;  %v2006_v45 = vpack.c.bf16 %v143_v37, %v137_v36  ;;  %v411_v47 = vld [vmem:[#allocation2 + $0x8b8] sm:$0xff]  ;;  %v417_v48 = vld [vmem:[#allocation2 + $0x8e8] sm:$0xff] }
  0xc1   :  { %1871 = vmatprep.subr.bf16.mxu0 %v1870_v58  ;;  %v1890_v58 = vpack.c.bf16 %v391_v51, %v385_v50  ;;  %v1984_v13 = vpack.c.bf16 %v368_v5, %v362_v4  ;;  %v149_v49 = vld [vmem:[#allocation2 + $0x88] sm:$0xff]  ;;  %v155_v50 = vld [vmem:[#allocation2 + $0xb8] sm:$0xff]  ;;  %v1998_v54 = vpack.c.bf16 %v417_v48, %v411_v47  ;;  %v428_v4 = vld [vmem:[#allocation2 + $0x940] sm:$0xff] }
  0xc2   :  { %v429_v60 = vld [vmem:[#allocation2 + $0x948] sm:$0xff]  ;;  %v167_v62 = vld [vmem:[#allocation2 + $0x118] sm:$0xff] }
  0xc3   :  { %505 = vmatmul.mubr.f32.vlgmr.msra.gmra.mrb[0].mxu0 %v2708_v34  ;;  %1965 = vmatpush1.bf16.msra.mxu1 %v1964_v14  ;;  %v161_v61 = vld [vmem:[#allocation2 + $0xe8] sm:$0xff]  ;;  %v893_v8 = vld [vmem:[#allocation5 + $0x18] sm:$0xff] }
  0xc4   :  { %1873 = vmatpush1.bf16.msra.mxu0 %v1872_v2  ;;  %1716 = vmatprep.mubr.msk.f32.mxu0 %vm437_vm0, %v2723_v11  ;;  %v396_v2 = vld [vmem:[#allocation2 + $0x840] sm:$0xff]  ;;  %v2014_v5 = vpack.c.bf16 %v167_v62, %v161_v61  ;;  %v173_v9 = vld [vmem:[#allocation2 + $0x148] sm:$0xff]  ;;  %v179_v10 = vld [vmem:[#allocation2 + $0x178] sm:$0xff] }
  0xc5   :  { %1875 = vmatprep.subr.bf16.mxu0 %v1874_v7  ;;  %1967 = vmatprep.subr.bf16.mxu1 %v1966_v17  ;;  %v402_v7 = vld [vmem:[#allocation2 + $0x870] sm:$0xff]  ;;  %v897_v21 = vld [vmem:[#allocation5 + $0x38] sm:$0xff]  ;;  %v185_v22 = vld [vmem:[#allocation2 + $0x1a8] sm:$0xff] }
  0xc6   :  { %v1896_v14 = vpack.c.bf16 %v402_v7, %v396_v2  ;;  %v374_v17 = vld [vmem:[#allocation2 + $0x790] sm:$0xff]  ;;  %v2002_v2 = vpack.c.bf16 %v429_v60, %v423_v59  ;;  %v891_v7 = vld [vmem:[#allocation5 + $0x8] sm:$0xff]  ;;  %v203_v35 = vld [vmem:[#allocation2 + $0x238] sm:$0xff] }
  0xc7   :  { %1969 = vmatpush1.bf16.msra.mxu1 %v1968_v26  ;;  %v1988_v25 = vpack.c.bf16 %v380_v18, %v374_v17  ;;  %v892_v17 = vld [vmem:[#allocation5 + $0x10] sm:$0xff]  ;;  %v2018_v18 = vpack.c.bf16 %v179_v10, %v173_v9  ;;  %v197_v33 = vld [vmem:[#allocation2 + $0x208] sm:$0xff]  ;;  %v215_v48 = vld [vmem:[#allocation2 + $0x298] sm:$0xff] }
  0xc8   :  { %1877 = vmatpush1.bf16.msra.mxu0 %v1876_v15  ;;  %1971 = vmatprep.subr.bf16.mxu1 %v1970_v29  ;;  %v408_v15 = vld [vmem:[#allocation2 + $0x8a0] sm:$0xff]  ;;  %v386_v29 = vld [vmem:[#allocation2 + $0x7f0] sm:$0xff]  ;;  %v209_v47 = vld [vmem:[#allocation2 + $0x268] sm:$0xff] }
  0xc9   :  { %1879 = vmatprep.subr.bf16.mxu0 %v1878_v20  ;;  %v414_v20 = vld [vmem:[#allocation2 + $0x8d0] sm:$0xff]  ;;  %v1992_v38 = vpack.c.bf16 %v392_v30, %v386_v29  ;;  %v221_v59 = vld [vmem:[#allocation2 + $0x2c8] sm:$0xff]  ;;  %v227_v60 = vld [vmem:[#allocation2 + $0x2f8] sm:$0xff] }
  0xca   :  { %647 = vmatmul.mubr.f32.vlgmr.msra.gmra.mrb[0].mxu1 %v2708_v34  ;;  %v1980_v34 = vpack.c.bf16 %v356_v57, %v350_v56  ;;  %v1900_v26 = vpack.c.bf16 %v414_v20, %v408_v15  ;;  %v416_v56 = vld [vmem:[#allocation2 + $0x8e0] sm:$0xff]  ;;  %v2010_v57 = vpack.c.bf16 %v155_v50, %v149_v49  ;;  %v2106_v15 = vpack.c.bf16 %v893_v8, %v891_v7  ;;  %v895_v20 = vld [vmem:[#allocation5 + $0x28] sm:$0xff]  ;;  %v190_v30 = vld [vmem:[#allocation2 + $0x1d0] sm:$0xff] }
  0xcb   :  { %1973 = vmatpush1.bf16.msra.mxu1 %v1972_v40  ;;  %1717 = vmatprep.mubr.msk.f32.mxu1 %vm437_vm0, %v2723_v11  ;;  %v233_v7 = vld [vmem:[#allocation2 + $0x328] sm:$0xff]  ;;  %v239_v8 = vld [vmem:[#allocation2 + $0x358] sm:$0xff] }
  0xcc   :  { %1881 = vmatpush1.bf16.msra.mxu0 %v1880_v27  ;;  %1975 = vmatprep.subr.bf16.mxu1 %v1974_v43  ;;  %v420_v27 = vld [vmem:[#allocation2 + $0x900] sm:$0xff]  ;;  %v398_v43 = vld [vmem:[#allocation2 + $0x850] sm:$0xff] }
  0xcd   :  { %1883 = vmatprep.subr.bf16.mxu0 %v1882_v32  ;;  %v426_v32 = vld [vmem:[#allocation2 + $0x930] sm:$0xff]  ;;  %v1996_v51 = vpack.c.bf16 %v404_v44, %v398_v43  ;;  %v2026_v43 = vpack.c.bf16 %v203_v35, %v197_v33 }
  0xce   :  { %v1904_v40 = vpack.c.bf16 %v426_v32, %v420_v27  ;;  %v894_v27 = vld [vmem:[#allocation5 + $0x20] sm:$0xff]  ;;  %v901_v32 = vld [vmem:[#allocation5 + $0x58] sm:$0xff]  ;;  %v202_v44 = vld [vmem:[#allocation2 + $0x230] sm:$0xff] }
  0xcf   :  { %1977 = vmatpush1.bf16.msra.mxu1 %v1976_v52 }
  0xd0   :  { %1885 = vmatpush1.bf16.msra.mxu0 %v1884_v41  ;;  %1979 = vmatprep.subr.bf16.mxu1 %v1978_v55  ;;  %v136_v41 = vld [vmem:[#allocation2 + $0x20] sm:$0xff]  ;;  %v410_v55 = vld [vmem:[#allocation2 + $0x8b0] sm:$0xff] }
  0xd1   :  { %1887 = vmatprep.subr.bf16.mxu0 %v1886_v46  ;;  %v142_v46 = vld [vmem:[#allocation2 + $0x50] sm:$0xff]  ;;  %v2000_v63 = vpack.c.bf16 %v416_v56, %v410_v55  ;;  %v2030_v55 = vpack.c.bf16 %v215_v48, %v209_v47 }
  0xd2   :  { %v2008_v52 = vpack.c.bf16 %v142_v46, %v136_v41  ;;  %v898_v41 = vld [vmem:[#allocation5 + $0x40] sm:$0xff]  ;;  %v905_v46 = vld [vmem:[#allocation5 + $0x78] sm:$0xff]  ;;  %v214_v56 = vld [vmem:[#allocation2 + $0x290] sm:$0xff] }
  0xd3   :  { %1981 = vmatpush1.bf16.msra.mxu1 %v1980_v34 }
  0xd4   :  { %1889 = vmatpush1.bf16.msra.mxu0 %v1888_v53  ;;  %1983 = vmatprep.subr.bf16.mxu1 %v1982_v3  ;;  %v148_v53 = vld [vmem:[#allocation2 + $0x80] sm:$0xff]  ;;  %v422_v3 = vld [vmem:[#allocation2 + $0x910] sm:$0xff] }
  0xd5   :  { %1891 = vmatprep.subr.bf16.mxu0 %v1890_v58  ;;  %v154_v58 = vld [vmem:[#allocation2 + $0xb0] sm:$0xff]  ;;  %v2004_v12 = vpack.c.bf16 %v428_v4, %v422_v3  ;;  %v2034_v3 = vpack.c.bf16 %v227_v60, %v221_v59 }
  0xd6   :  { %v2012_v34 = vpack.c.bf16 %v154_v58, %v148_v53  ;;  %v902_v53 = vld [vmem:[#allocation5 + $0x60] sm:$0xff]  ;;  %v909_v58 = vld [vmem:[#allocation5 + $0x98] sm:$0xff]  ;;  %v226_v4 = vld [vmem:[#allocation2 + $0x2f0] sm:$0xff] }
  0xd7   :  { %1985 = vmatpush1.bf16.msra.mxu1 %v1984_v13 }
  0xd8   :  { %1893 = vmatpush1.bf16.msra.mxu0 %v1892_v1  ;;  %1987 = vmatprep.subr.bf16.mxu1 %v1986_v16  ;;  %v160_v1 = vld [vmem:[#allocation2 + $0xe0] sm:$0xff] }
  0xd9   :  { %1895 = vmatprep.subr.bf16.mxu0 %v1894_v6  ;;  %v166_v6 = vld [vmem:[#allocation2 + $0x110] sm:$0xff]  ;;  %v890_v16 = vld [vmem:[#allocation5] sm:$0xff] }
  0xda   :  { %v2016_v13 = vpack.c.bf16 %v166_v6, %v160_v1  ;;  %v2108_v23 = vpack.c.bf16 %v892_v17, %v890_v16  ;;  %v906_v1 = vld [vmem:[#allocation5 + $0x80] sm:$0xff]  ;;  %v913_v6 = vld [vmem:[#allocation5 + $0xb8] sm:$0xff]  ;;  %v2038_v16 = vpack.c.bf16 %v239_v8, %v233_v7  ;;  %v238_v17 = vld [vmem:[#allocation2 + $0x350] sm:$0xff] }
  0xdb   :  { %1989 = vmatpush1.bf16.msra.mxu1 %v1988_v25  ;;  %v184_v25 = vld [vmem:[#allocation2 + $0x1a0] sm:$0xff] }
  0xdc   :  { %1897 = vmatpush1.bf16.msra.mxu0 %v1896_v14  ;;  %1991 = vmatprep.subr.bf16.mxu1 %v1990_v28  ;;  %v172_v14 = vld [vmem:[#allocation2 + $0x140] sm:$0xff]  ;;  %v896_v28 = vld [vmem:[#allocation5 + $0x30] sm:$0xff]  ;;  %v2024_v37 = vpack.c.bf16 %v190_v30, %v184_v25  ;;  %v921_v30 = vld [vmem:[#allocation5 + $0xf8] sm:$0xff] }
  0xdd   :  { %1899 = vmatprep.subr.bf16.mxu0 %v1898_v19  ;;  %v178_v19 = vld [vmem:[#allocation2 + $0x170] sm:$0xff]  ;;  %v2112_v36 = vpack.c.bf16 %v896_v28, %v894_v27  ;;  %v914_v25 = vld [vmem:[#allocation5 + $0xc0] sm:$0xff] }
  0xde   :  { %v2020_v24 = vpack.c.bf16 %v178_v19, %v172_v14  ;;  %v910_v14 = vld [vmem:[#allocation5 + $0xa0] sm:$0xff]  ;;  %v917_v19 = vld [vmem:[#allocation5 + $0xd8] sm:$0xff]  ;;  %v250_v28 = vld [vmem:[#allocation2 + $0x3b0] sm:$0xff] }
  0xdf   :  { %1993 = vmatpush1.bf16.msra.mxu1 %v1992_v38  ;;  %v196_v38 = vld [vmem:[#allocation2 + $0x200] sm:$0xff] }
  0xe0   :  { %1901 = vmatpush1.bf16.msra.mxu0 %v1900_v26  ;;  %1995 = vmatprep.subr.bf16.mxu1 %v1994_v42  ;;  %v2110_v26 = vpack.c.bf16 %v897_v21, %v895_v20  ;;  %v900_v42 = vld [vmem:[#allocation5 + $0x50] sm:$0xff]  ;;  %v2028_v50 = vpack.c.bf16 %v202_v44, %v196_v38  ;;  %v245_v20 = vld [vmem:[#allocation2 + $0x388] sm:$0xff]  ;;  %v251_v21 = vld [vmem:[#allocation2 + $0x3b8] sm:$0xff] }
  0xe1   :  { %1903 = vmatprep.subr.bf16.mxu0 %v1902_v31  ;;  %v899_v31 = vld [vmem:[#allocation5 + $0x48] sm:$0xff]  ;;  %v2116_v49 = vpack.c.bf16 %v900_v42, %v898_v41  ;;  %v2042_v27 = vpack.c.bf16 %v251_v21, %v245_v20  ;;  %v918_v38 = vld [vmem:[#allocation5 + $0xe0] sm:$0xff]  ;;  %v262_v42 = vld [vmem:[#allocation2 + $0x410] sm:$0xff] }
  0xe2   :  { %v925_v44 = vld [vmem:[#allocation5 + $0x118] sm:$0xff] }
  0xe3   :  { %1997 = vmatpush1.bf16.msra.mxu1 %v1996_v51  ;;  %v208_v51 = vld [vmem:[#allocation2 + $0x260] sm:$0xff] }
  0xe4   :  { %1905 = vmatpush1.bf16.msra.mxu0 %v1904_v40  ;;  %1999 = vmatprep.subr.bf16.mxu1 %v1998_v54  ;;  %v2114_v40 = vpack.c.bf16 %v901_v32, %v899_v31  ;;  %v904_v54 = vld [vmem:[#allocation5 + $0x70] sm:$0xff]  ;;  %v2032_v62 = vpack.c.bf16 %v214_v56, %v208_v51  ;;  %v257_v31 = vld [vmem:[#allocation2 + $0x3e8] sm:$0xff]  ;;  %v263_v32 = vld [vmem:[#allocation2 + $0x418] sm:$0xff] }
  0xe5   :  { %2007 = vmatprep.subr.bf16.mxu0 %v2006_v45  ;;  %v903_v45 = vld [vmem:[#allocation5 + $0x68] sm:$0xff]  ;;  %v2120_v61 = vpack.c.bf16 %v904_v54, %v902_v53  ;;  %v2046_v41 = vpack.c.bf16 %v263_v32, %v257_v31  ;;  %v922_v51 = vld [vmem:[#allocation5 + $0x100] sm:$0xff]  ;;  %v274_v54 = vld [vmem:[#allocation2 + $0x470] sm:$0xff] }
  0xe6   :  { %v929_v56 = vld [vmem:[#allocation5 + $0x138] sm:$0xff] }
  0xe7   :  { %576 = vmatmul.mubr.f32.vlgmr.msra.gmra.mrb[0].mxu0 %v2719_v0  ;;  %2001 = vmatpush1.bf16.msra.mxu1 %v2000_v63  ;;  %v220_v63 = vld [vmem:[#allocation2 + $0x2c0] sm:$0xff] }
  0xe8   :  { %2009 = vmatpush1.bf16.msra.mxu0 %v2008_v52  ;;  %788 = vmatprep.mubr.f32.mxu0 %v2712_v39  ;;  %v191_v39 = vld [vmem:[#allocation2 + $0x1d8] sm:$0xff]  ;;  %v2118_v52 = vpack.c.bf16 %v905_v46, %v903_v45  ;;  %v2036_v10 = vpack.c.bf16 %v226_v4, %v220_v63  ;;  %v269_v45 = vld [vmem:[#allocation2 + $0x448] sm:$0xff]  ;;  %v926_v63 = vld [vmem:[#allocation5 + $0x120] sm:$0xff] }
  0xe9   :  { %2011 = vmatprep.subr.bf16.mxu0 %v2010_v57  ;;  %2003 = vmatprep.subr.bf16.mxu1 %v2002_v2  ;;  %v2022_v29 = vpack.c.bf16 %v191_v39, %v185_v22  ;;  %v907_v57 = vld [vmem:[#allocation5 + $0x88] sm:$0xff]  ;;  %v908_v2 = vld [vmem:[#allocation5 + $0x90] sm:$0xff]  ;;  %v275_v46 = vld [vmem:[#allocation2 + $0x478] sm:$0xff] }
  0xea   :  { %v2124_v9 = vpack.c.bf16 %v908_v2, %v906_v1  ;;  %v2050_v53 = vpack.c.bf16 %v275_v46, %v269_v45  ;;  %v286_v2 = vld [vmem:[#allocation2 + $0x4d0] sm:$0xff]  ;;  %v933_v4 = vld [vmem:[#allocation5 + $0x158] sm:$0xff] }
  0xeb   :  { %2005 = vmatpush1.bf16.msra.mxu1 %v2004_v12  ;;  %v232_v12 = vld [vmem:[#allocation2 + $0x320] sm:$0xff] }
  0xec   :  { %2013 = vmatpush1.bf16.msra.mxu0 %v2012_v34  ;;  %2107 = vmatprep.subr.bf16.mxu1 %v2106_v15  ;;  %v2122_v34 = vpack.c.bf16 %v909_v58, %v907_v57  ;;  %v912_v15 = vld [vmem:[#allocation5 + $0xb0] sm:$0xff]  ;;  %v2040_v39 = vpack.c.bf16 %v238_v17, %v232_v12  ;;  %v281_v57 = vld [vmem:[#allocation2 + $0x4a8] sm:$0xff]  ;;  %v287_v58 = vld [vmem:[#allocation2 + $0x4d8] sm:$0xff] }
  0xed   :  { %2015 = vmatprep.subr.bf16.mxu0 %v2014_v5  ;;  %v911_v5 = vld [vmem:[#allocation5 + $0xa8] sm:$0xff]  ;;  %v2128_v22 = vpack.c.bf16 %v912_v15, %v910_v14  ;;  %v2054_v1 = vpack.c.bf16 %v287_v58, %v281_v57  ;;  %v930_v12 = vld [vmem:[#allocation5 + $0x140] sm:$0xff]  ;;  %v298_v15 = vld [vmem:[#allocation2 + $0x530] sm:$0xff] }
  0xee   :  { %718 = vmatmul.mubr.f32.vlgmr.msra.gmra.mrb[0].mxu1 %v2719_v0  ;;  %v937_v17 = vld [vmem:[#allocation5 + $0x178] sm:$0xff] }
  0xef   :  { %2109 = vmatpush1.bf16.msra.mxu1 %v2108_v23  ;;  %v244_v23 = vld [vmem:[#allocation2 + $0x380] sm:$0xff] }
  0xf0   :  { %2017 = vmatpush1.bf16.msra.mxu0 %v2016_v13  ;;  %2111 = vmatprep.subr.bf16.mxu1 %v2110_v26  ;;  %v2126_v13 = vpack.c.bf16 %v913_v6, %v911_v5  ;;  %v916_v26 = vld [vmem:[#allocation5 + $0xd0] sm:$0xff]  ;;  %v2044_v35 = vpack.c.bf16 %v250_v28, %v244_v23  ;;  %v293_v5 = vld [vmem:[#allocation2 + $0x508] sm:$0xff]  ;;  %v299_v6 = vld [vmem:[#allocation2 + $0x538] sm:$0xff] }
  0xf1   :  { %2019 = vmatprep.subr.bf16.mxu0 %v2018_v18  ;;  %v915_v18 = vld [vmem:[#allocation5 + $0xc8] sm:$0xff]  ;;  %v2132_v33 = vpack.c.bf16 %v916_v26, %v914_v25  ;;  %v2058_v14 = vpack.c.bf16 %v299_v6, %v293_v5  ;;  %v934_v23 = vld [vmem:[#allocation5 + $0x160] sm:$0xff]  ;;  %v310_v26 = vld [vmem:[#allocation2 + $0x590] sm:$0xff] }
  0xf2   :  { %v941_v28 = vld [vmem:[#allocation5 + $0x198] sm:$0xff] }
  0xf3   :  { %2113 = vmatpush1.bf16.msra.mxu1 %v2112_v36  ;;  %v256_v36 = vld [vmem:[#allocation2 + $0x3e0] sm:$0xff] }
  0xf4   :  { %2021 = vmatpush1.bf16.msra.mxu0 %v2020_v24  ;;  %2115 = vmatprep.subr.bf16.mxu1 %v2114_v40  ;;  %v2130_v24 = vpack.c.bf16 %v917_v19, %v915_v18  ;;  %v920_v40 = vld [vmem:[#allocation5 + $0xf0] sm:$0xff]  ;;  %v2048_v48 = vpack.c.bf16 %v262_v42, %v256_v36  ;;  %v305_v18 = vld [vmem:[#allocation2 + $0x568] sm:$0xff]  ;;  %v311_v19 = vld [vmem:[#allocation2 + $0x598] sm:$0xff] }
  0xf5   :  { %2023 = vmatprep.subr.bf16.mxu0 %v2022_v29  ;;  %v919_v29 = vld [vmem:[#allocation5 + $0xe8] sm:$0xff]  ;;  %v2136_v47 = vpack.c.bf16 %v920_v40, %v918_v38  ;;  %v2062_v25 = vpack.c.bf16 %v311_v19, %v305_v18  ;;  %v938_v36 = vld [vmem:[#allocation5 + $0x180] sm:$0xff]  ;;  %v322_v40 = vld [vmem:[#allocation2 + $0x5f0] sm:$0xff] }
  0xf6   :  { %v945_v42 = vld [vmem:[#allocation5 + $0x1b8] sm:$0xff]  ;;  %v376_v19 = vld [vmem:[#allocation2 + $0x7a0] sm:$0xff] }
  0xf7   :  { %2117 = vmatpush1.bf16.msra.mxu1 %v2116_v49  ;;  %v268_v49 = vld [vmem:[#allocation2 + $0x440] sm:$0xff] }
  0xf8   :  { %2025 = vmatpush1.bf16.msra.mxu0 %v2024_v37  ;;  %2119 = vmatprep.subr.bf16.mxu1 %v2118_v52  ;;  %v2134_v37 = vpack.c.bf16 %v921_v30, %v919_v29  ;;  %v924_v52 = vld [vmem:[#allocation5 + $0x110] sm:$0xff]  ;;  %v2052_v60 = vpack.c.bf16 %v274_v54, %v268_v49  ;;  %v317_v29 = vld [vmem:[#allocation2 + $0x5c8] sm:$0xff]  ;;  %v323_v30 = vld [vmem:[#allocation2 + $0x5f8] sm:$0xff] }
  0xf9   :  { %2027 = vmatprep.subr.bf16.mxu0 %v2026_v43  ;;  %v923_v43 = vld [vmem:[#allocation5 + $0x108] sm:$0xff]  ;;  %v2140_v59 = vpack.c.bf16 %v924_v52, %v922_v51  ;;  %v2066_v38 = vpack.c.bf16 %v323_v30, %v317_v29  ;;  %v944_v49 = vld [vmem:[#allocation5 + $0x1b0] sm:$0xff]  ;;  %v328_v51 = vld [vmem:[#allocation2 + $0x620] sm:$0xff] }
  0xfa   :  { %v334_v52 = vld [vmem:[#allocation2 + $0x650] sm:$0xff]  ;;  %v347_v54 = vld [vmem:[#allocation2 + $0x6b8] sm:$0xff] }
  0xfb   :  { %2121 = vmatpush1.bf16.msra.mxu1 %v2120_v61  ;;  %v280_v61 = vld [vmem:[#allocation2 + $0x4a0] sm:$0xff]  ;;  %v2072_v58 = vpack.c.bf16 %v334_v52, %v328_v51  ;;  %v953_v29 = vld [vmem:[#allocation5 + $0x1f8] sm:$0xff] }
  0xfc   :  { %2029 = vmatpush1.bf16.msra.mxu0 %v2028_v50  ;;  %2123 = vmatprep.subr.bf16.mxu1 %v2122_v34  ;;  %v2138_v50 = vpack.c.bf16 %v925_v44, %v923_v43  ;;  %v928_v34 = vld [vmem:[#allocation5 + $0x130] sm:$0xff]  ;;  %v2056_v8 = vpack.c.bf16 %v286_v2, %v280_v61  ;;  %v329_v43 = vld [vmem:[#allocation2 + $0x628] sm:$0xff]  ;;  %v335_v44 = vld [vmem:[#allocation2 + $0x658] sm:$0xff] }
  0xfd   :  { %2031 = vmatprep.subr.bf16.mxu0 %v2030_v55  ;;  %v927_v55 = vld [vmem:[#allocation5 + $0x128] sm:$0xff]  ;;  %v2144_v7 = vpack.c.bf16 %v928_v34, %v926_v63  ;;  %v346_v63 = vld [vmem:[#allocation2 + $0x6b0] sm:$0xff]  ;;  %v359_v2 = vld [vmem:[#allocation2 + $0x718] sm:$0xff] }
  0xff   :  { %2125 = vmatpush1.bf16.msra.mxu1 %v2124_v9  ;;  %v292_v9 = vld [vmem:[#allocation2 + $0x500] sm:$0xff] }
 0x100   :  { %2033 = vmatpush1.bf16.msra.mxu0 %v2032_v62  ;;  %2127 = vmatprep.subr.bf16.mxu1 %v2126_v13  ;;  %v2142_v62 = vpack.c.bf16 %v929_v56, %v927_v55  ;;  %v932_v13 = vld [vmem:[#allocation5 + $0x150] sm:$0xff]  ;;  %v2060_v21 = vpack.c.bf16 %v298_v15, %v292_v9  ;;  %v947_v55 = vld [vmem:[#allocation5 + $0x1c8] sm:$0xff]  ;;  %v949_v56 = vld [vmem:[#allocation5 + $0x1d8] sm:$0xff] }
 0x101   :  { %2035 = vmatprep.subr.bf16.mxu0 %v2034_v3  ;;  %v931_v3 = vld [vmem:[#allocation5 + $0x148] sm:$0xff]  ;;  %v2148_v20 = vpack.c.bf16 %v932_v13, %v930_v12  ;;  %v2162_v34 = vpack.c.bf16 %v949_v56, %v947_v55  ;;  %v370_v15 = vld [vmem:[#allocation2 + $0x770] sm:$0xff]  ;;  %v1346_v56 = vld [vmem:[%s2913_s5 + $0x80] sm:$0xff] }
 0x102   :  { %v365_v9 = vld [vmem:[#allocation2 + $0x748] sm:$0xff] }
 0x103   :  { %2129 = vmatpush1.bf16.msra.mxu1 %v2128_v22  ;;  %v304_v22 = vld [vmem:[#allocation2 + $0x560] sm:$0xff] }
 0x104   :  { %2037 = vmatpush1.bf16.msra.mxu0 %v2036_v10  ;;  %2131 = vmatprep.subr.bf16.mxu1 %v2130_v24  ;;  %v2146_v10 = vpack.c.bf16 %v933_v4, %v931_v3  ;;  %v936_v24 = vld [vmem:[#allocation5 + $0x170] sm:$0xff]  ;;  %v2064_v32 = vpack.c.bf16 %v310_v26, %v304_v22  ;;  %v2344_v3 = vld [vmem:[%s2908_s0] sm:$0xff]  ;;  %v395_v22 = vld [vmem:[#allocation2 + $0x838] sm:$0xff] }
 0x105   :  { %2039 = vmatprep.subr.bf16.mxu0 %v2038_v16  ;;  %v935_v16 = vld [vmem:[#allocation5 + $0x168] sm:$0xff]  ;;  %v2152_v31 = vpack.c.bf16 %v936_v24, %v934_v23  ;;  %v388_v24 = vld [vmem:[#allocation2 + $0x800] sm:$0xff] }
 0x106   :  { %v401_v26 = vld [vmem:[#allocation2 + $0x868] sm:$0xff] }
 0x107   :  { %2133 = vmatpush1.bf16.msra.mxu1 %v2132_v33  ;;  %v316_v33 = vld [vmem:[#allocation2 + $0x5c0] sm:$0xff] }
 0x108   :  { %2041 = vmatpush1.bf16.msra.mxu0 %v2040_v39  ;;  %2135 = vmatprep.subr.bf16.mxu1 %v2134_v37  ;;  %v2150_v39 = vpack.c.bf16 %v937_v17, %v935_v16  ;;  %v940_v37 = vld [vmem:[#allocation5 + $0x190] sm:$0xff]  ;;  %v2068_v46 = vpack.c.bf16 %v322_v40, %v316_v33  ;;  %v377_v16 = vld [vmem:[#allocation2 + $0x7a8] sm:$0xff]  ;;  %v383_v17 = vld [vmem:[#allocation2 + $0x7d8] sm:$0xff] }
 0x109   :  { %2043 = vmatprep.subr.bf16.mxu0 %v2042_v27  ;;  %v939_v27 = vld [vmem:[#allocation5 + $0x188] sm:$0xff]  ;;  %v2156_v45 = vpack.c.bf16 %v940_v37, %v938_v36  ;;  %v952_v33 = vld [vmem:[#allocation5 + $0x1f0] sm:$0xff]  ;;  %v400_v36 = vld [vmem:[#allocation2 + $0x860] sm:$0xff] }
 0x10a   :  { %v406_v37 = vld [vmem:[#allocation2 + $0x890] sm:$0xff]  ;;  %v413_v40 = vld [vmem:[#allocation2 + $0x8c8] sm:$0xff] }
 0x10b   :  { %2137 = vmatpush1.bf16.msra.mxu1 %v2136_v47 }
 0x10c   :  { %2045 = vmatpush1.bf16.msra.mxu0 %v2044_v35  ;;  %2139 = vmatprep.subr.bf16.mxu1 %v2138_v50  ;;  %v2154_v35 = vpack.c.bf16 %v941_v28, %v939_v27  ;;  %v2070_v50 = vpack.c.bf16 %v335_v44, %v329_v43  ;;  %v407_v27 = vld [vmem:[#allocation2 + $0x898] sm:$0xff]  ;;  %v951_v28 = vld [vmem:[#allocation5 + $0x1e8] sm:$0xff]  ;;  %v2096_v44 = vpack.c.bf16 %v406_v37, %v400_v36  ;;  %v974_v36 = vld [vmem:[#allocation5 + $0x2a0] sm:$0xff] }
 0x10d   :  { %2047 = vmatprep.subr.bf16.mxu0 %v2046_v41  ;;  %v943_v41 = vld [vmem:[#allocation5 + $0x1a8] sm:$0xff]  ;;  %v957_v43 = vld [vmem:[#allocation5 + $0x218] sm:$0xff]  ;;  %v976_v37 = vld [vmem:[#allocation5 + $0x2b0] sm:$0xff] }
 0x10e   :  { %v2158_v47 = vpack.c.bf16 %v945_v42, %v943_v41  ;;  %v419_v41 = vld [vmem:[#allocation2 + $0x8f8] sm:$0xff]  ;;  %v955_v42 = vld [vmem:[#allocation5 + $0x208] sm:$0xff] }
 0x10f   :  { %2141 = vmatpush1.bf16.msra.mxu1 %v2140_v59  ;;  %v946_v59 = vld [vmem:[#allocation5 + $0x1c0] sm:$0xff] }
 0x110   :  { %2049 = vmatpush1.bf16.msra.mxu0 %v2048_v48  ;;  %2143 = vmatprep.subr.bf16.mxu1 %v2142_v62  ;;  %v942_v48 = vld [vmem:[#allocation5 + $0x1a0] sm:$0xff] }
 0x111   :  { %2051 = vmatprep.subr.bf16.mxu0 %v2050_v53  ;;  %v341_v53 = vld [vmem:[#allocation2 + $0x688] sm:$0xff]  ;;  %v2160_v57 = vpack.c.bf16 %v944_v49, %v942_v48  ;;  %v340_v62 = vld [vmem:[#allocation2 + $0x680] sm:$0xff]  ;;  %v418_v48 = vld [vmem:[#allocation2 + $0x8f0] sm:$0xff] }
 0x112   :  { %v2074_v61 = vpack.c.bf16 %v347_v54, %v341_v53  ;;  %v2076_v5 = vpack.c.bf16 %v346_v63, %v340_v62  ;;  %v425_v49 = vld [vmem:[#allocation2 + $0x928] sm:$0xff]  ;;  %v424_v53 = vld [vmem:[#allocation2 + $0x920] sm:$0xff]  ;;  %v430_v54 = vld [vmem:[#allocation2 + $0x950] sm:$0xff] }
 0x113   :  { %2145 = vmatpush1.bf16.msra.mxu1 %v2144_v7  ;;  %v352_v7 = vld [vmem:[#allocation2 + $0x6e0] sm:$0xff]  ;;  %v2104_v55 = vpack.c.bf16 %v430_v54, %v424_v53  ;;  %v956_v62 = vld [vmem:[#allocation5 + $0x210] sm:$0xff] }
 0x114   :  { %2053 = vmatpush1.bf16.msra.mxu0 %v2052_v60  ;;  %2147 = vmatprep.subr.bf16.mxu1 %v2146_v10  ;;  %v948_v60 = vld [vmem:[#allocation5 + $0x1d0] sm:$0xff]  ;;  %v371_v10 = vld [vmem:[#allocation2 + $0x778] sm:$0xff] }
 0x115   :  { %2055 = vmatprep.subr.bf16.mxu0 %v2054_v1  ;;  %v353_v1 = vld [vmem:[#allocation2 + $0x6e8] sm:$0xff]  ;;  %v2164_v4 = vpack.c.bf16 %v948_v60, %v946_v59  ;;  %v2082_v13 = vpack.c.bf16 %v371_v10, %v365_v9  ;;  %v960_v9 = vld [vmem:[#allocation5 + $0x230] sm:$0xff] }
 0x116   :  { %v2078_v6 = vpack.c.bf16 %v359_v2, %v353_v1  ;;  %v1331_v60 = vld [vmem:[%s2913_s5 + $0x8] sm:$0xff]  ;;  %v961_v1 = vld [vmem:[#allocation5 + $0x238] sm:$0xff] }
 0x117   :  { %2149 = vmatpush1.bf16.msra.mxu1 %v2148_v20  ;;  %v382_v20 = vld [vmem:[#allocation2 + $0x7d0] sm:$0xff]  ;;  %v963_v10 = vld [vmem:[#allocation5 + $0x248] sm:$0xff] }
 0x118   :  { %2057 = vmatpush1.bf16.msra.mxu0 %v2056_v8  ;;  %2151 = vmatprep.subr.bf16.mxu1 %v2150_v39  ;;  %v358_v8 = vld [vmem:[#allocation2 + $0x710] sm:$0xff]  ;;  %v2088_v39 = vpack.c.bf16 %v382_v20, %v376_v19  ;;  %v966_v20 = vld [vmem:[#allocation5 + $0x260] sm:$0xff] }
 0x119   :  { %2059 = vmatprep.subr.bf16.mxu0 %v2058_v14  ;;  %v2080_v12 = vpack.c.bf16 %v358_v8, %v352_v7  ;;  %v364_v14 = vld [vmem:[#allocation2 + $0x740] sm:$0xff] }
 0x11a   :  { %v2084_v18 = vpack.c.bf16 %v370_v15, %v364_v14  ;;  %v958_v8 = vld [vmem:[#allocation5 + $0x220] sm:$0xff] }
 0x11b   :  { %2153 = vmatpush1.bf16.msra.mxu1 %v2152_v31  ;;  %v2166_v31 = vpack.c.bf16 %v953_v29, %v951_v28  ;;  %v962_v15 = vld [vmem:[#allocation5 + $0x240] sm:$0xff] }
 0x11c   :  { %2061 = vmatpush1.bf16.msra.mxu0 %v2060_v21  ;;  %2155 = vmatprep.subr.bf16.mxu1 %v2154_v35  ;;  %v389_v21 = vld [vmem:[#allocation2 + $0x808] sm:$0xff]  ;;  %v2094_v35 = vpack.c.bf16 %v407_v27, %v401_v26  ;;  %v970_v29 = vld [vmem:[#allocation5 + $0x280] sm:$0xff] }
 0x11d   :  { %2063 = vmatprep.subr.bf16.mxu0 %v2062_v25  ;;  %v2090_v23 = vpack.c.bf16 %v395_v22, %v389_v21  ;;  %v394_v25 = vld [vmem:[#allocation2 + $0x830] sm:$0xff] }
 0x11e   :  { %v2092_v30 = vpack.c.bf16 %v394_v25, %v388_v24  ;;  %v968_v21 = vld [vmem:[#allocation5 + $0x270] sm:$0xff] }
 0x11f   :  { %2157 = vmatpush1.bf16.msra.mxu1 %v2156_v45  ;;  %v2170_v45 = vpack.c.bf16 %v957_v43, %v955_v42  ;;  %v2184_v27 = vpack.c.bf16 %v968_v21, %v966_v20  ;;  %v978_v43 = vld [vmem:[#allocation5 + $0x2c0] sm:$0xff]  ;;  %v1008_v21 = vld [vmem:[#allocation5 + $0x3b0] sm:$0xff] }
 0x120   :  { %2065 = vmatpush1.bf16.msra.mxu0 %v2064_v32  ;;  %2159 = vmatprep.subr.bf16.mxu1 %v2158_v47  ;;  %v950_v32 = vld [vmem:[#allocation5 + $0x1e0] sm:$0xff] }
 0x121   :  { %2067 = vmatprep.subr.bf16.mxu0 %v2066_v38  ;;  %v2168_v38 = vpack.c.bf16 %v952_v33, %v950_v32  ;;  %v412_v47 = vld [vmem:[#allocation2 + $0x8c0] sm:$0xff]  ;;  %v977_v32 = vld [vmem:[#allocation5 + $0x2b8] sm:$0xff] }
 0x122   :  { %v2100_v51 = vpack.c.bf16 %v418_v48, %v412_v47  ;;  %v1006_v20 = vld [vmem:[#allocation5 + $0x3a0] sm:$0xff] }
 0x123   :  { %2161 = vmatpush1.bf16.msra.mxu1 %v2160_v57  ;;  %v1347_v57 = vld [vmem:[%s2913_s5 + $0x88] sm:$0xff] }
 0x124   :  { %2069 = vmatpush1.bf16.msra.mxu0 %v2068_v46  ;;  %2163 = vmatprep.subr.bf16.mxu1 %v2162_v34  ;;  %v2098_v46 = vpack.c.bf16 %v419_v41, %v413_v40  ;;  %v2266_v59 = vpack.c.bf16 %v1347_v57, %v1346_v56  ;;  %v959_v34 = vld [vmem:[#allocation5 + $0x228] sm:$0xff]  ;;  %v981_v40 = vld [vmem:[#allocation5 + $0x2d8] sm:$0xff]  ;;  %v2192_v41 = vpack.c.bf16 %v976_v37, %v974_v36  ;;  %v988_v56 = vld [vmem:[#allocation5 + $0x310] sm:$0xff] }
 0x125   :  { %2071 = vmatprep.subr.bf16.mxu0 %v2070_v50  ;;  %v431_v50 = vld [vmem:[#allocation2 + $0x958] sm:$0xff]  ;;  %v2174_v7 = vpack.c.bf16 %v961_v1, %v959_v34  ;;  %v991_v57 = vld [vmem:[#allocation5 + $0x328] sm:$0xff] }
 0x126   :  { %v2102_v52 = vpack.c.bf16 %v431_v50, %v425_v49  ;;  %v982_v49 = vld [vmem:[#allocation5 + $0x2e0] sm:$0xff]  ;;  %v984_v50 = vld [vmem:[#allocation5 + $0x2f0] sm:$0xff]  ;;  %v1021_v36 = vld [vmem:[#allocation5 + $0x418] sm:$0xff] }
 0x127   :  { %789 = vmatmul.mubr.f32.vlgmr.msra.gmra.mrb[2].mxu0 %v2344_v3  ;;  %2165 = vmatpush1.bf16.msra.mxu1 %v2164_v4  ;;  %v2200_v53 = vpack.c.bf16 %v984_v50, %v982_v49  ;;  %v1027_v49 = vld [vmem:[#allocation5 + $0x448] sm:$0xff]  ;;  %v1029_v50 = vld [vmem:[#allocation5 + $0x458] sm:$0xff] }
 0x128   :  { %2073 = vmatpush1.bf16.msra.mxu0 %v2072_v58  ;;  %1718 = vmatprep.mubr.msk.f32.mxu0 %vm437_vm0, %v2723_v11  ;;  %v2086_v11 = vpack.c.bf16 %v383_v17, %v377_v16  ;;  %v1330_v58 = vld [vmem:[%s2913_s5] sm:$0xff]  ;;  %v964_v16 = vld [vmem:[#allocation5 + $0x250] sm:$0xff]  ;;  %v967_v17 = vld [vmem:[#allocation5 + $0x268] sm:$0xff] }
 0x129   :  { %2075 = vmatprep.subr.bf16.mxu0 %v2074_v61  ;;  %2167 = vmatprep.subr.bf16.mxu1 %v2166_v31  ;;  %v2268_v61 = vpack.c.bf16 %v1331_v60, %v1330_v58  ;;  %v975_v31 = vld [vmem:[#allocation5 + $0x2a8] sm:$0xff]  ;;  %v993_v58 = vld [vmem:[#allocation5 + $0x338] sm:$0xff] }
 0x12a   :  { %v2206_v60 = vpack.c.bf16 %v993_v58, %v991_v57 }
 0x12b   :  { %2169 = vmatpush1.bf16.msra.mxu1 %v2168_v38  ;;  %v979_v38 = vld [vmem:[#allocation5 + $0x2c8] sm:$0xff] }
 0x12c   :  { %2077 = vmatpush1.bf16.msra.mxu0 %v2076_v5  ;;  %2171 = vmatprep.subr.bf16.mxu1 %v2170_v45  ;;  %v2194_v42 = vpack.c.bf16 %v981_v40, %v979_v38  ;;  %v983_v45 = vld [vmem:[#allocation5 + $0x2e8] sm:$0xff]  ;;  %v1018_v40 = vld [vmem:[#allocation5 + $0x400] sm:$0xff] }
 0x12d   :  { %2079 = vmatprep.subr.bf16.mxu0 %v2078_v6 }
 0x130   :  { %2081 = vmatpush1.bf16.msra.mxu0 %v2080_v12  ;;  %v965_v12 = vld [vmem:[#allocation5 + $0x258] sm:$0xff] }
 0x131   :  { %2083 = vmatprep.subr.bf16.mxu0 %v2082_v13  ;;  %v2176_v13 = vpack.c.bf16 %v960_v9, %v958_v8  ;;  %v2178_v14 = vpack.c.bf16 %v965_v12, %v963_v10  ;;  %v998_v8 = vld [vmem:[#allocation5 + $0x360] sm:$0xff]  ;;  %v1000_v9 = vld [vmem:[#allocation5 + $0x370] sm:$0xff]  ;;  %v1003_v10 = vld [vmem:[#allocation5 + $0x388] sm:$0xff] }
 0x132   :  { %v1005_v12 = vld [vmem:[#allocation5 + $0x398] sm:$0xff] }
 0x134   :  { %2085 = vmatpush1.bf16.msra.mxu0 %v2084_v18  ;;  %v969_v18 = vld [vmem:[#allocation5 + $0x278] sm:$0xff] }
 0x135   :  { %2087 = vmatprep.subr.bf16.mxu0 %v2086_v11  ;;  %v2180_v11 = vpack.c.bf16 %v964_v16, %v962_v15  ;;  %v2182_v19 = vpack.c.bf16 %v969_v18, %v967_v17  ;;  %v1002_v15 = vld [vmem:[#allocation5 + $0x380] sm:$0xff]  ;;  %v1004_v16 = vld [vmem:[#allocation5 + $0x390] sm:$0xff]  ;;  %v1007_v17 = vld [vmem:[#allocation5 + $0x3a8] sm:$0xff] }
 0x136   :  { %v1009_v18 = vld [vmem:[#allocation5 + $0x3b8] sm:$0xff] }
 0x138   :  { %2089 = vmatpush1.bf16.msra.mxu0 %v2088_v39  ;;  %v971_v39 = vld [vmem:[#allocation5 + $0x288] sm:$0xff] }
 0x139   :  { %2091 = vmatprep.subr.bf16.mxu0 %v2090_v23  ;;  %v973_v23 = vld [vmem:[#allocation5 + $0x298] sm:$0xff] }
 0x13a   :  { %v2186_v28 = vpack.c.bf16 %v973_v23, %v971_v39  ;;  %v1011_v39 = vld [vmem:[#allocation5 + $0x3c8] sm:$0xff]  ;;  %v1013_v23 = vld [vmem:[#allocation5 + $0x3d8] sm:$0xff] }
 0x13c   :  { %2093 = vmatpush1.bf16.msra.mxu0 %v2092_v30  ;;  %v972_v30 = vld [vmem:[#allocation5 + $0x290] sm:$0xff] }
 0x13d   :  { %2095 = vmatprep.subr.bf16.mxu0 %v2094_v35  ;;  %v2188_v33 = vpack.c.bf16 %v972_v30, %v970_v29  ;;  %v2190_v35 = vpack.c.bf16 %v977_v32, %v975_v31  ;;  %v1017_v29 = vld [vmem:[#allocation5 + $0x3f8] sm:$0xff]  ;;  %v1014_v32 = vld [vmem:[#allocation5 + $0x3e0] sm:$0xff] }
 0x140   :  { %2097 = vmatpush1.bf16.msra.mxu0 %v2096_v44  ;;  %v980_v44 = vld [vmem:[#allocation5 + $0x2d0] sm:$0xff] }
 0x141   :  { %2099 = vmatprep.subr.bf16.mxu0 %v2098_v46  ;;  %v985_v46 = vld [vmem:[#allocation5 + $0x2f8] sm:$0xff]  ;;  %v2196_v47 = vpack.c.bf16 %v980_v44, %v978_v43 }
 0x142   :  { %v2198_v48 = vpack.c.bf16 %v985_v46, %v983_v45  ;;  %v1025_v43 = vld [vmem:[#allocation5 + $0x438] sm:$0xff] }
 0x144   :  { %2101 = vmatpush1.bf16.msra.mxu0 %v2100_v51  ;;  %v987_v51 = vld [vmem:[#allocation5 + $0x308] sm:$0xff] }
 0x145   :  { %2103 = vmatprep.subr.bf16.mxu0 %v2102_v52  ;;  %v989_v52 = vld [vmem:[#allocation5 + $0x318] sm:$0xff] }
 0x146   :  { %v2202_v54 = vpack.c.bf16 %v989_v52, %v987_v51  ;;  %v2242_v52 = vpack.c.bf16 %v1029_v50, %v1027_v49  ;;  %v1338_v49 = vld [vmem:[%s2913_s5 + $0x40] sm:$0xff] }
 0x148   :  { %2105 = vmatpush1.bf16.msra.mxu0 %v2104_v55  ;;  %v986_v55 = vld [vmem:[#allocation5 + $0x300] sm:$0xff] }
 0x149   :  { %2267 = vmatprep.subr.bf16.mxu0 %v2266_v59  ;;  %v2204_v59 = vpack.c.bf16 %v988_v56, %v986_v55  ;;  %v1031_v55 = vld [vmem:[#allocation5 + $0x468] sm:$0xff]  ;;  %v1033_v56 = vld [vmem:[#allocation5 + $0x478] sm:$0xff] }
 0x14a   :  { %v2246_v58 = vpack.c.bf16 %v1033_v56, %v1031_v55  ;;  %v1340_v56 = vld [vmem:[%s2913_s5 + $0x50] sm:$0xff] }
 0x14b   :  { %860 = vmatmul.mubr.f32.vlgmr.msra.gmra.mrb[2].mxu0 %v2719_v0  ;;  %v954_v0 = vld [vmem:[#allocation5 + $0x200] sm:$0xff] }
 0x14c   :  { %2269 = vmatpush3.bf16.msra.mxu0 %v2268_v61  ;;  %v2172_v5 = vpack.c.bf16 %v956_v62, %v954_v0  ;;  %v990_v61 = vld [vmem:[#allocation5 + $0x320] sm:$0xff]  ;;  %v992_v0 = vld [vmem:[#allocation5 + $0x330] sm:$0xff]  ;;  %v995_v62 = vld [vmem:[#allocation5 + $0x348] sm:$0xff] }
 0x14d   :  { %v2208_v34 = vpack.c.bf16 %v992_v0, %v990_v61  ;;  %v1037_v61 = vld [vmem:[#allocation5 + $0x498] sm:$0xff] }
 0x1ba   :  { %v577_v63 = vpop.f32.mrb[0].mxu0 }
 0x1bb   :  { %v579_v2 = vpop.f32.mrb[1].mxu0  ;;  %v884_v6 = vmax.f32 %v577_v63, 0.0 }
 0x1bc   :  { %v872_v3 = vcombine.low %v577_v63, %v579_v2  ;;  %v885_v4 = vmax.f32 %v579_v2, 0.0  ;;  %v997_v63 = vld [vmem:[#allocation5 + $0x358] sm:$0xff]  ;;  %v994_v2 = vld [vmem:[#allocation5 + $0x340] sm:$0xff] }
 0x1bd   :  { %v2210_v1 = vpack.c.bf16 %v997_v63, %v995_v62  ;;  %v1034_v63 = vld [vmem:[#allocation5 + $0x480] sm:$0xff] }
 0x1be   :  { %878 = vst [vmem:[%s2920_s12] sm:$0xff] %v872_v3  ;;  %1120 = vmatprep.mubr.f32.mxu1 %v885_v4  ;;  %v996_v3 = vld [vmem:[#allocation5 + $0x350] sm:$0xff]  ;;  %v999_v4 = vld [vmem:[#allocation5 + $0x368] sm:$0xff] }
 0x1bf   :  { %1121 = vmatmul.mubr.f32.vlgmr.msra.gmra.mrb[2].mxu1 %v884_v6  ;;  %v2212_v6 = vpack.c.bf16 %v996_v3, %v994_v2  ;;  %v1041_v2 = vld [vmem:[#allocation5 + $0x4b8] sm:$0xff] }
 0x1c0   :  { %2173 = vmatpush1.bf16.msra.mxu1 %v2172_v5  ;;  %v1001_v5 = vld [vmem:[#allocation5 + $0x378] sm:$0xff] }
 0x1c1   :  { %2175 = vmatprep.subr.bf16.mxu1 %v2174_v7  ;;  %v2755_v22 = vpop.f32.mrb[0].mxu1  ;;  %v2214_v7 = vpack.c.bf16 %v1001_v5, %v999_v4  ;;  %v1038_v5 = vld [vmem:[#allocation5 + $0x4a0] sm:$0xff] }
 0x1c2   :  { %v721_v24 = vpop.f32.mrb[1].mxu1  ;;  %v886_v45 = vmax.f32 %v2755_v22, 0.0 }
 0x1c3   :  { %v873_v25 = vcombine.low %v2755_v22, %v721_v24  ;;  %v887_v26 = vmax.f32 %v721_v24, 0.0  ;;  %v2224_v24 = vpack.c.bf16 %v1008_v21, %v1006_v20  ;;  %v1030_v22 = vld [vmem:[#allocation5 + $0x460] sm:$0xff]  ;;  %v1051_v20 = vld [vmem:[#allocation5 + $0x508] sm:$0xff] }
 0x1c4   :  { %2177 = vmatpush1.bf16.msra.mxu1 %v2176_v13  ;;  %v2216_v13 = vpack.c.bf16 %v1000_v9, %v998_v8  ;;  %v1045_v8 = vld [vmem:[#allocation5 + $0x4d8] sm:$0xff]  ;;  %v1050_v21 = vld [vmem:[#allocation5 + $0x500] sm:$0xff] }
 0x1c5   :  { %2179 = vmatprep.subr.bf16.mxu1 %v2178_v14  ;;  %879 = vst [vmem:[%s2920_s12 + $0x8] sm:$0xff] %v873_v25  ;;  %1191 = vmatprep.mubr.f32.mxu1 %v887_v26  ;;  %v2218_v14 = vpack.c.bf16 %v1005_v12, %v1003_v10  ;;  %v2226_v25 = vpack.c.bf16 %v1013_v23, %v1011_v39  ;;  %v1010_v26 = vld [vmem:[#allocation5 + $0x3c0] sm:$0xff] }
 0x1c6   :  { %v1042_v12 = vld [vmem:[#allocation5 + $0x4c0] sm:$0xff] }
 0x1c8   :  { %2181 = vmatpush1.bf16.msra.mxu1 %v2180_v11  ;;  %v2220_v11 = vpack.c.bf16 %v1004_v16, %v1002_v15  ;;  %v1049_v15 = vld [vmem:[#allocation5 + $0x4f8] sm:$0xff] }
 0x1c9   :  { %2183 = vmatprep.subr.bf16.mxu1 %v2182_v19  ;;  %v2222_v19 = vpack.c.bf16 %v1009_v18, %v1007_v17  ;;  %v1046_v18 = vld [vmem:[#allocation5 + $0x4e0] sm:$0xff] }
 0x1cc   :  { %2185 = vmatpush1.bf16.msra.mxu1 %v2184_v27  ;;  %v1012_v27 = vld [vmem:[#allocation5 + $0x3d0] sm:$0xff] }
 0x1cd   :  { %2187 = vmatprep.subr.bf16.mxu1 %v2186_v28  ;;  %v1015_v28 = vld [vmem:[#allocation5 + $0x3e8] sm:$0xff]  ;;  %v2228_v30 = vpack.c.bf16 %v1012_v27, %v1010_v26  ;;  %v1348_v27 = vld [vmem:[%s2913_s5 + $0x90] sm:$0xff] }
 0x1ce   :  { %v2230_v31 = vpack.c.bf16 %v1017_v29, %v1015_v28  ;;  %v1349_v28 = vld [vmem:[%s2913_s5 + $0x98] sm:$0xff] }
 0x1cf   :  { %v2270_v29 = vpack.c.bf16 %v1349_v28, %v1348_v27 }
 0x1d0   :  { %2189 = vmatpush1.bf16.msra.mxu1 %v2188_v33  ;;  %v1016_v33 = vld [vmem:[#allocation5 + $0x3f0] sm:$0xff] }
 0x1d1   :  { %2191 = vmatprep.subr.bf16.mxu1 %v2190_v35  ;;  %v1019_v35 = vld [vmem:[#allocation5 + $0x408] sm:$0xff]  ;;  %v2232_v37 = vpack.c.bf16 %v1016_v33, %v1014_v32  ;;  %2271 = vmatprep.subr.bf16.mxu0 %v2270_v29  ;;  %v1350_v33 = vld [vmem:[%s2913_s5 + $0xa0] sm:$0xff] }
 0x1d2   :  { %v2234_v38 = vpack.c.bf16 %v1021_v36, %v1019_v35  ;;  %v1351_v35 = vld [vmem:[%s2913_s5 + $0xa8] sm:$0xff] }
 0x1d3   :  { %v2274_v36 = vpack.c.bf16 %v1351_v35, %v1350_v33 }
 0x1d4   :  { %2193 = vmatpush1.bf16.msra.mxu1 %v2192_v41  ;;  %v1020_v41 = vld [vmem:[#allocation5 + $0x410] sm:$0xff] }
 0x1d5   :  { %2195 = vmatprep.subr.bf16.mxu1 %v2194_v42  ;;  %v1023_v42 = vld [vmem:[#allocation5 + $0x428] sm:$0xff]  ;;  %v2236_v44 = vpack.c.bf16 %v1020_v41, %v1018_v40  ;;  %v1352_v41 = vld [vmem:[%s2913_s5 + $0xb0] sm:$0xff] }
 0x1d6   :  { %v2238_v46 = vpack.c.bf16 %v1025_v43, %v1023_v42  ;;  %v1353_v42 = vld [vmem:[%s2913_s5 + $0xb8] sm:$0xff] }
 0x1d7   :  { %v2278_v43 = vpack.c.bf16 %v1353_v42, %v1352_v41 }
 0x1d8   :  { %2197 = vmatpush1.bf16.msra.mxu1 %v2196_v47  ;;  %v1022_v47 = vld [vmem:[#allocation5 + $0x420] sm:$0xff] }
 0x1d9   :  { %2199 = vmatprep.subr.bf16.mxu1 %v2198_v48  ;;  %v1024_v48 = vld [vmem:[#allocation5 + $0x430] sm:$0xff] }
 0x1da   :  { %v2240_v51 = vpack.c.bf16 %v1024_v48, %v1022_v47  ;;  %v1354_v47 = vld [vmem:[%s2913_s5 + $0xc0] sm:$0xff]  ;;  %v1355_v48 = vld [vmem:[%s2913_s5 + $0xc8] sm:$0xff] }
 0x1db   :  { %v2282_v50 = vpack.c.bf16 %v1355_v48, %v1354_v47  ;;  %v1435_v47 = vld [vmem:[%s2914_s6 + $0x10] sm:$0xff]  ;;  %v1436_v48 = vld [vmem:[%s2914_s6 + $0x18] sm:$0xff] }
 0x1dc   :  { %2201 = vmatpush1.bf16.msra.mxu1 %v2200_v53  ;;  %v1026_v53 = vld [vmem:[#allocation5 + $0x440] sm:$0xff] }
 0x1dd   :  { %2203 = vmatprep.subr.bf16.mxu1 %v2202_v54  ;;  %v1028_v54 = vld [vmem:[#allocation5 + $0x450] sm:$0xff] }
 0x1de   :  { %v2244_v57 = vpack.c.bf16 %v1028_v54, %v1026_v53  ;;  %v1357_v53 = vld [vmem:[%s2913_s5 + $0xd8] sm:$0xff] }
 0x1e0   :  { %2205 = vmatpush1.bf16.msra.mxu1 %v2204_v59  ;;  %v1032_v59 = vld [vmem:[#allocation5 + $0x470] sm:$0xff] }
 0x1e1   :  { %2207 = vmatprep.subr.bf16.mxu1 %v2206_v60  ;;  %v1035_v60 = vld [vmem:[#allocation5 + $0x488] sm:$0xff]  ;;  %v2248_v0 = vpack.c.bf16 %v1032_v59, %v1030_v22 }
 0x1e2   :  { %v2250_v62 = vpack.c.bf16 %v1037_v61, %v1035_v60  ;;  %v1359_v22 = vld [vmem:[%s2913_s5 + $0xe8] sm:$0xff]  ;;  %v1342_v61 = vld [vmem:[%s2913_s5 + $0x60] sm:$0xff] }
 0x1e4   :  { %2209 = vmatpush1.bf16.msra.mxu1 %v2208_v34  ;;  %v1036_v34 = vld [vmem:[#allocation5 + $0x490] sm:$0xff] }
 0x1e5   :  { %2211 = vmatprep.subr.bf16.mxu1 %v2210_v1  ;;  %v1039_v1 = vld [vmem:[#allocation5 + $0x4a8] sm:$0xff]  ;;  %v2252_v3 = vpack.c.bf16 %v1036_v34, %v1034_v63  ;;  %v1361_v63 = vld [vmem:[%s2913_s5 + $0xf8] sm:$0xff] }
 0x1e6   :  { %v2254_v4 = vpack.c.bf16 %v1041_v2, %v1039_v1  ;;  %v1344_v2 = vld [vmem:[%s2913_s5 + $0x70] sm:$0xff] }
 0x1e8   :  { %2213 = vmatpush1.bf16.msra.mxu1 %v2212_v6  ;;  %v1040_v6 = vld [vmem:[#allocation5 + $0x4b0] sm:$0xff] }
 0x1e9   :  { %2215 = vmatprep.subr.bf16.mxu1 %v2214_v7  ;;  %v1043_v7 = vld [vmem:[#allocation5 + $0x4c8] sm:$0xff]  ;;  %v2256_v9 = vpack.c.bf16 %v1040_v6, %v1038_v5  ;;  %v2542_v5 = vmov 0.0|0.0   ;;  %v1278_v6 = vlaneseq }
 0x1ea   :  { %v2258_v10 = vpack.c.bf16 %v1045_v8, %v1043_v7 }
 0x1eb   :  { %v1279_v7 = vshrl.u32 %v1278_v6, 7 }
 0x1ec   :  { %2217 = vmatpush1.bf16.msra.mxu1 %v2216_v13  ;;  %v1044_v13 = vld [vmem:[#allocation5 + $0x4d0] sm:$0xff] }
 0x1ed   :  { %2219 = vmatprep.subr.bf16.mxu1 %v2218_v14  ;;  %v1047_v14 = vld [vmem:[#allocation5 + $0x4e8] sm:$0xff]  ;;  %v2260_v16 = vpack.c.bf16 %v1044_v13, %v1042_v12  ;;  %v1280_v8 = vsub.s32 0, %v1279_v7  ;;  %v1284_v12 = vsub.s32 1, %v1279_v7 }
 0x1ee   :  { %v2262_v17 = vpack.c.bf16 %v1049_v15, %v1047_v14 }
 0x1f0   :  { %2221 = vmatpush1.bf16.msra.mxu1 %v2220_v11  ;;  %v1048_v11 = vld [vmem:[#allocation5 + $0x4f0] sm:$0xff] }
 0x1f1   :  { %2223 = vmatprep.subr.bf16.mxu1 %v2222_v19  ;;  %v2264_v19 = vpack.c.bf16 %v1048_v11, %v1046_v18 }
 0x1f4   :  { %2225 = vmatpush1.bf16.msra.mxu1 %v2224_v24 }
 0x1f5   :  { %2227 = vmatprep.subr.bf16.mxu1 %v2226_v25 }
 0x1f8   :  { %2229 = vmatpush1.bf16.msra.mxu1 %v2228_v30  ;;  %v1332_v30 = vld [vmem:[%s2913_s5 + $0x10] sm:$0xff] }
 0x1f9   :  { %2231 = vmatprep.subr.bf16.mxu1 %v2230_v31  ;;  %v1333_v31 = vld [vmem:[%s2913_s5 + $0x18] sm:$0xff] }
 0x1fa   :  { %v2272_v32 = vpack.c.bf16 %v1333_v31, %v1332_v30 }
 0x1fc   :  { %2233 = vmatpush1.bf16.msra.mxu1 %v2232_v37  ;;  %2273 = vmatpush3.bf16.msra.mxu0 %v2272_v32  ;;  %v1334_v37 = vld [vmem:[%s2913_s5 + $0x20] sm:$0xff] }
 0x1fd   :  { %2235 = vmatprep.subr.bf16.mxu1 %v2234_v38  ;;  %v1335_v38 = vld [vmem:[%s2913_s5 + $0x28] sm:$0xff]  ;;  %2275 = vmatprep.subr.bf16.mxu0 %v2274_v36 }
 0x1fe   :  { %v2276_v40 = vpack.c.bf16 %v1335_v38, %v1334_v37  ;;  %v1433_v37 = vld [vmem:[%s2914_s6] sm:$0xff]  ;;  %v1434_v38 = vld [vmem:[%s2914_s6 + $0x8] sm:$0xff] }
 0x1ff   :  { %1192 = vmatmul.mubr.f32.vlgmr.msra.gmra.mrb[2].mxu1 %v886_v45  ;;  %v1337_v45 = vld [vmem:[%s2913_s5 + $0x38] sm:$0xff] }
 0x200   :  { %2237 = vmatpush1.bf16.msra.mxu1 %v2236_v44  ;;  %2277 = vmatpush3.bf16.msra.mxu0 %v2276_v40  ;;  %v1336_v44 = vld [vmem:[%s2913_s5 + $0x30] sm:$0xff] }
 0x201   :  { %2239 = vmatprep.subr.bf16.mxu1 %v2238_v46  ;;  %v2280_v46 = vpack.c.bf16 %v1337_v45, %v1336_v44  ;;  %2279 = vmatprep.subr.bf16.mxu0 %v2278_v43  ;;  %v2299_v45 = vpack.c.bf16 %v1434_v38, %v1433_v37 }
 0x204   :  { %2241 = vmatpush1.bf16.msra.mxu1 %v2240_v51  ;;  %2281 = vmatpush3.bf16.msra.mxu0 %v2280_v46  ;;  %v1339_v51 = vld [vmem:[%s2913_s5 + $0x48] sm:$0xff] }
 0x205   :  { %2243 = vmatprep.subr.bf16.mxu1 %v2242_v52  ;;  %v1356_v52 = vld [vmem:[%s2913_s5 + $0xd0] sm:$0xff]  ;;  %v2284_v54 = vpack.c.bf16 %v1339_v51, %v1338_v49  ;;  %2283 = vmatprep.subr.bf16.mxu0 %v2282_v50  ;;  %v2302_v50 = vpack.c.bf16 %v1436_v48, %v1435_v47  ;;  %v1437_v51 = vld [vmem:[%s2914_s6 + $0x20] sm:$0xff] }
 0x206   :  { %v2286_v55 = vpack.c.bf16 %v1357_v53, %v1356_v52  ;;  %v1438_v52 = vld [vmem:[%s2914_s6 + $0x28] sm:$0xff] }
 0x207   :  { %v2305_v53 = vpack.c.bf16 %v1438_v52, %v1437_v51 }
 0x208   :  { %2245 = vmatpush1.bf16.msra.mxu1 %v2244_v57  ;;  %v1341_v57 = vld [vmem:[%s2913_s5 + $0x58] sm:$0xff]  ;;  %2285 = vmatpush3.bf16.msra.mxu0 %v2284_v54  ;;  %v1439_v54 = vld [vmem:[%s2914_s6 + $0x30] sm:$0xff] }
 0x209   :  { %2247 = vmatprep.subr.bf16.mxu1 %v2246_v58  ;;  %v1358_v58 = vld [vmem:[%s2913_s5 + $0xe0] sm:$0xff]  ;;  %v2288_v59 = vpack.c.bf16 %v1341_v57, %v1340_v56  ;;  %2287 = vmatprep.subr.bf16.mxu0 %v2286_v55  ;;  %v1440_v55 = vld [vmem:[%s2914_s6 + $0x38] sm:$0xff]  ;;  %v2544_v57 = vmov 0.0  }
 0x20a   :  { %v2290_v60 = vpack.c.bf16 %v1359_v22, %v1358_v58  ;;  %v2308_v56 = vpack.c.bf16 %v1440_v55, %v1439_v54 }
 0x20c   :  { %2249 = vmatpush1.bf16.msra.mxu1 %v2248_v0  ;;  %v1343_v0 = vld [vmem:[%s2913_s5 + $0x68] sm:$0xff]  ;;  %2289 = vmatpush3.bf16.msra.mxu0 %v2288_v59 }
 0x20d   :  { %2251 = vmatprep.subr.bf16.mxu1 %v2250_v62  ;;  %v1360_v62 = vld [vmem:[%s2913_s5 + $0xf0] sm:$0xff]  ;;  %v2292_v34 = vpack.c.bf16 %v1343_v0, %v1342_v61  ;;  %2291 = vmatprep.subr.bf16.mxu0 %v2290_v60  ;;  %v1523_v61 = vld [vmem:[%s2916_s8] sm:$0xff]  ;;  %v1524_v0 = vld [vmem:[%s2916_s8 + $0x8] sm:$0xff]  ;;  %s2545_s8 = smov [#allocation14]  }
 0x20e   :  { %v2294_v1 = vpack.c.bf16 %v1361_v63, %v1360_v62  ;;  %v2311_v62 = vpack.c.bf16 %v1524_v0, %v1523_v61  ;;  %v1720_v63 = vld [vmem:[#allocation10] ss:$0 sm:$0xff]  ;;  %s1700_s4 = sshll.u32 %s2545_s8, 4  ;;  %s1701_s4 = int_to_ptr.vmem [resolvable:$true] %s1700_s4 }
 0x20f   :  { %s2499_s27 = scalar_lea.vmem %s1701_s4, 32  ;;  %p2504_p1 = scmp.lt.s32.totalorder %s1701_s4, %s1701_s4 }
 0x210   :  { %2253 = vmatpush1.bf16.msra.mxu1 %v2252_v3  ;;  %v1345_v3 = vld [vmem:[%s2913_s5 + $0x78] sm:$0xff]  ;;  %2293 = vmatpush3.bf16.msra.mxu0 %v2292_v34  ;;  %p2500_p0 = scmp.ne.s32.totalorder %s1701_s4, %s2499_s27  ;;  %p2505_p2 = scmp.lt.s32.totalorder %s2499_s27, %s2499_s27 }
 0x211   :  { %2255 = vmatprep.subr.bf16.mxu1 %v2254_v4  ;;  %v2296_v4 = vpack.c.bf16 %v1345_v3, %v1344_v2  ;;  %2295 = vmatprep.subr.bf16.mxu0 %v2294_v1 }
 0x212   :  { %p2506_p3 = por %p2505_p2, %p2504_p1 }
 0x214   :  { %2257 = vmatpush1.bf16.msra.mxu1 %v2256_v9  ;;  %2297 = vmatpush3.bf16.msra.mxu0 %v2296_v4  ;;  %v1276_v9 = vld [vmem:[#allocation7] sm:$0x3]  ;;  %v1606_v4 = vld [vmem:[%s2918_s10] sm:$0xff]  ;;  %p2507_p4 = pnand %p2506_p3, %p2500_p0 }
 0x215   :  { %2259 = vmatprep.subr.bf16.mxu1 %v2258_v10  ;;  %2298 = vmatprep.subr.bf16.mxu0 %v2542_v5  ;;  %v1290_v10 = vld [vmem:[#allocation8] sm:$0x3]  ;;  %v1281_v13 = vrot.slane %v1276_v9, %v1280_v8 }
 0x216   :  { %v1295_v14 = vrot.slane %v1290_v10, %v1280_v8 }
 0x218   :  { %2261 = vmatpush1.bf16.msra.mxu1 %v2260_v16  ;;  %v1285_v16 = vrot.slane %v1276_v9, %v1284_v12 }
 0x219   :  { %2263 = vmatprep.subr.bf16.mxu1 %v2262_v17  ;;  %v1299_v17 = vrot.slane %v1290_v10, %v1284_v12  ;;  %v1724_v10 = vld [vmem:[#allocation13] ss:$0 sm:$0xff] }
 0x21c   :  { %2265 = vmatpush1.bf16.msra.mxu1 %v2264_v19 }
 0x21d   :  { %1230 = vmatprep.subr.mxu1 %v1051_v20 }
 0x21e   :  { %v861_v39 = vpop.f32.mrb[2].mxu0 }
 0x21f   :  { %v863_v23 = vpop.f32.mrb[3].mxu0  ;;  %v888_v26 = vmax.f32 %v861_v39, 0.0 }
 0x220   :  { %v874_v24 = vcombine.low %v861_v39, %v863_v23  ;;  %v889_v25 = vmax.f32 %v863_v23, 0.0  ;;  %1231 = vmatpush1.msra.mxu1 %v1050_v21 }
 0x222   :  { %883 = vst.msk [vmem:[%s2920_s12 + $0x10] sm:$0xff] %vm882_vm3, %v874_v24  ;;  %1719 = vmatprep.mubr.msk.f32.mxu1 %vm1052_vm4, %v889_v25 }
 0x223   :  { %1263 = vmatmul.mubr.f32.vlgmr.msra.gmra.mrb[2].mxu1 %v888_v26 }
 0x2f6   :  { %v1264_v15 = vpop.f32.mrb[2].mxu1 }
 0x2f7   :  { %v1274_v18 = vmax.f32 %v1264_v15, 0.0  ;;  %v1266_v11 = vpop.f32.mrb[3].mxu1 }
 0x2f8   :  { %v1271_v19 = vcombine.low %v1264_v15, %v1266_v11  ;;  %v1275_v20 = vmax.f32 %v1266_v11, 0.0 }
 0x2f9   :  { %v1288_v21 = vsub.f32 %v1274_v18, %v1281_v13  ;;  %v1302_v39 = vsub.f32 %v1274_v18, %v1295_v14 }
 0x2fa   :  { %1273 = vst [vmem:[%s2921_s13] sm:$0xff] %v1271_v19  ;;  %v1289_v23 = vsub.f32 %v1275_v20, %v1285_v16  ;;  %v1303_v24 = vsub.f32 %v1275_v20, %v1299_v17 }
 0x2fb   :  { %v1306_v25 = vmul.f32 %v1302_v39, %v1302_v39  ;;  %v1304_v27 = vmul.f32 %v1288_v21, %v1288_v21 }
 0x2fc   :  { %v1307_v26 = vmul.f32 %v1303_v24, %v1303_v24  ;;  %v1305_v29 = vmul.f32 %v1289_v23, %v1289_v23 }
 0x2fd   :  { %v1310_v28 = vrot.slane %v1306_v25, 2 }
 0x2fe   :  { %v1311_v30 = vrot.slane %v1307_v26, 2 }
 0x2ff   :  { %v1314_v31 = vadd.f32 %v1310_v28, %v1304_v27 }
 0x300   :  { %v1315_v32 = vadd.f32 %v1311_v30, %v1305_v29 }
 0x301   :  { %2340 = vrsqrt.f32 %v1314_v31  ;;  %vm1318_vm5 = vcmp.eq.f32.partialorder %v1314_v31, inf  ;;  %v1321_v44 = vand.u32 2147483648, %v1314_v31  ;;  %vm1320_vm8 = vcmp.eq.f32.partialorder %v1314_v31, 0.0 }
 0x302   :  { %2342 = vrsqrt.f32 %v1315_v32  ;;  %vm1325_vm6 = vcmp.eq.f32.partialorder %v1315_v32, inf  ;;  %v1328_v41 = vand.u32 2147483648, %v1315_v32  ;;  %vm1327_vm7 = vcmp.eq.f32.partialorder %v1315_v32, 0.0 }
 0x30b   :  { %v2341_v33 = vpop.eup %2340 }
 0x30c   :  { %v2343_v35 = vpop.eup %2342  ;;  %v1317_v36 = vmul.f32 %v2341_v33, %v1314_v31 }
 0x30d   :  { %v1324_v40 = vmul.f32 %v2343_v35, %v1315_v32 }
 0x30e   :  { %v1319_v42 = vsel %vm1318_vm5, %v1314_v31, %v1317_v36 }
 0x30f   :  { %v1326_v43 = vsel %vm1325_vm6, %v1315_v32, %v1324_v40  ;;  %v1322_v49 = vsel %vm1320_vm8, %v1321_v44, %v1319_v42 }
 0x310   :  { %v1329_v46 = vsel %vm1327_vm7, %v1328_v41, %v1326_v43 }
 0x311   :  { %1426 = vmatprep.mubr.f32.mxu0 %v1329_v46 }
 0x312   :  { %1427 = vmatmul.mubr.f32.vlgmr.msra.gmra.mrb[4].mxu0 %v1322_v49 }
 0x313   :  { %2300 = vmatpush3.bf16.msra.mxu0 %v2299_v45  ;;  %1791 = vmatprep.mubr.msk.f32.mxu0 %vm2543_vm9, %v2544_v57 }
 0x314   :  { %2301 = vmatprep.subr.bf16.mxu0 %v2542_v5 }
 0x317   :  { %2303 = vmatpush3.bf16.msra.mxu0 %v2302_v50 }
 0x318   :  { %2304 = vmatprep.subr.bf16.mxu0 %v2542_v5 }
 0x31b   :  { %2306 = vmatpush3.bf16.msra.mxu0 %v2305_v53 }
 0x31c   :  { %2307 = vmatprep.subr.bf16.mxu0 %v2542_v5 }
 0x31f   :  { %2309 = vmatpush3.bf16.msra.mxu0 %v2308_v56 }
 0x320   :  { %2310 = vmatprep.subr.bf16.mxu0 %v2542_v5  ;;  %v1722_v5 = vld [vmem:[#allocation11] ss:$0 sm:$0xff] }
 0x3e5   :  { %v1758_v58 = vpop.f32.mrb[4].mxu0 }
 0x3e6   :  { %v1759_v22 = vpop.f32.mrb[5].mxu0 }
 0x3e7   :  { %v1760_v59 = vadd.f32 %v1759_v22, %v1758_v58 }
 0x3e9   :  { %v1432_v60 = vmax.f32 %v1760_v59, 0.0 }
 0x3eb   :  { %1792 = vmatmul.mubr.msk.f32.vlgmr.msra.gmra.mrb[6].mxu0 %vm1448_vm10, %v1432_v60 }
 0x3ec   :  { %1798 = vmatprep.mubr.msk.f32.mxu0 %vm2543_vm9, %v2544_v57  ;;  %2312 = vmatpush3.bf16.msra.mxu0 %v2311_v62 }
 0x3ed   :  { %1801 = vmatprep.subr.mxu0 %v2544_v57 }
 0x4be   :  { %v1518_v34 = vpop.f32.mrb[6].mxu0 }
 0x4bf   :  { %v1519_v1 = vadd.f32 %v1720_v63, %v1518_v34  ;;  %v1793_v2 = vpop.f32.mrb[7].mxu0 }
 0x4c1   :  { %v1522_v3 = vmax.f32 %v1519_v1, 0.0 }
 0x4c3   :  { %1799 = vmatmul.mubr.msk.f32.vlgmr.msra.gmra.mrb[8].mxu0 %vm437_vm0, %v1522_v3 }
 0x4c4   :  { %1803 = vmatprep.mubr.msk.f32.mxu0 %vm2543_vm9, %v2544_v57  ;;  %1802 = vmatpush3.msra.mxu0 %v1606_v4 }
 0x596   :  { %v1601_v6 = vpop.f32.mrb[8].mxu0 }
 0x597   :  { %v1602_v7 = vadd.f32 %v1722_v5, %v1601_v6  ;;  %v1800_v8 = vpop.f32.mrb[9].mxu0 }
 0x599   :  { %v1605_v9 = vmax.f32 %v1602_v7, 0.0 }
 0x59b   :  { %1804 = vmatmul.mubr.msk.f32.vlgmr.msra.gmra.mrb[10].mxu0 %vm1052_vm4, %v1605_v9 }
 0x66e   :  { %v1683_v12 = vpop.f32.mrb[10].mxu0 }
 0x66f   :  { %v1684_v13 = vadd.f32 %v1724_v10, %v1683_v12  ;;  %v1805_v14 = vpop.f32.mrb[11].mxu0 }
 0x671   :  { %v1687_v15 = vmax.f32 %v1684_v13, 0.0 }
 0x673   :  { %1689 = vst.msk [vmem:[#allocation14] sm:$0x3] %vm1688_vm11, %v1687_v15 }
 0x674   :  { %2510 = shalt.err (!%p2507_p4)
}
 0x675   :  { %s2511_s9 = scalar_lea.hbm %s2922_s14, 32 }
 0x676   :  { %p2512_p5 = scmp.ne.s32.totalorder %s2922_s14, %s2511_s9  ;;  %p2515_p6 = scmp.lt.u32.totalorder %s2511_s9, %s2922_s14 }
 0x678   :  { %p2517_p7 = pnand %p2515_p6, %p2512_p5 }
 0x67a   :  { %2520 = shalt.err (!%p2517_p7)
}
 0x67b   :  { %1703 = dma.vmem_to_hbm [thread:$0]  %s1701_s4, 32, %s2922_s14, [#allocation4]  }
 0x67c   :  { %2529 = dma.done.wait [#allocation4], 32  }
 0x67d   :  { %2530 = vsyncadd [#allocation4], 4294967264 }
 0x67e   :  { %1711 = vsyncpa [#allocation3], 1 }
 0x67f   :  { %1712 = vsyncpa [#allocation6], 1 }
 0x680   :  { %1713 = vsyncpa [#allocation9], 1 }
 0x681   :  { %1714 = vsyncpa [#allocation12], 1 }
 0x682   :  { %1715 = vsyncpa [#allocation4], 1 }

</bundles_post_ra>
